<compile_context>
chip_gen: v7x
topology: tpu7x:2x2x1
jax: 0.10.0
libtpu: 0.0.40
codegen_flags: <defaults>
</compile_context>

<pallas_src>
import functools

import jax
import jax.numpy as jnp
from jax import lax
from jax.experimental import pallas as pl
from jax.experimental.pallas import tpu as pltpu

L_SIGNAL = 101  # spatial length fixed by the model (branch input = 2 * 101)


def _vmem_spec():
    return pl.BlockSpec(memory_space=pltpu.MemorySpace.VMEM)


# ----------------------------------------------------------------------------
# Fused forward kernel
# ----------------------------------------------------------------------------

def _build_fused_kernel(*, B, n_conv, n_channels, kernel_size, n_bres, n_tres,
                        p, beta):
    L = L_SIGNAL
    K = kernel_size
    pad = K // 2
    Lp = L + 2 * pad           # per-sample zero-padded length
    CORE = B * Lp              # flattened (batch-major) padded activation length
    E = CORE + 2 * pad         # + global halo so every conv tap is a static slice
    c_in0 = 3

    n_inputs = 3 + 2 * n_conv + 16

    def kernel(*refs):
        in_refs = refs[:n_inputs]
        u_ref, v_ref = refs[n_inputs], refs[n_inputs + 1]
        pad_ref, flat_ref = refs[n_inputs + 2], refs[n_inputs + 3]

        it = iter(in_refs)
        bi_ref = next(it)            # (B, 2L)
        ti_ref = next(it)            # (Nc, 2)
        mask_ref = next(it)          # (1, CORE) validity mask (zeroes the pads)
        conv_wb = [(next(it), next(it)) for _ in range(n_conv)]
        projw_ref, projb_ref = next(it), next(it)
        bw1_ref, bb1_ref, bw2_ref, bb2_ref = (next(it) for _ in range(4))
        outw_ref, outb_ref = next(it), next(it)
        tinw_ref, tinb_ref = next(it), next(it)
        tw1_ref, tb1_ref, tw2_ref, tb2_ref = (next(it) for _ in range(4))
        toutw_ref, toutb_ref = next(it), next(it)

        f32 = jnp.float32

        # ---------- branch: conv stack, fully VMEM resident -----------------
        pad_ref[...] = jnp.zeros_like(pad_ref)
        y_row = (lax.broadcasted_iota(jnp.int32, (1, L), 1).astype(f32)
                 * (1.0 / (L - 1)))                               # linspace(0,1,L)
        for b in range(B):
            c0 = b * Lp + 2 * pad                                 # data column start
            pad_ref[0:1, c0:c0 + L] = bi_ref[b:b + 1, 0:L]        # g_x
            pad_ref[1:2, c0:c0 + L] = bi_ref[b:b + 1, L:2 * L]    # g_y
            pad_ref[2:3, c0:c0 + L] = y_row                       # y coordinates

        valid = mask_ref[...]                                     # (1, CORE)

        c_in = c_in0
        for w_ref, b_ref in conv_wb:
            c_out = n_channels
            a_ext = pad_ref[0:c_in, :]                            # (c_in, E)
            acc = jnp.zeros((c_out, CORE), f32)
            for k in range(K):                                    # K shifted matmuls
                wk = w_ref[k * c_out:(k + 1) * c_out, :]          # (c_out, c_in)
                acc = acc + jnp.dot(wk, a_ext[:, k:k + CORE],
                                    preferred_element_type=f32)
            y = jnp.tanh(acc + b_ref[...]) * valid                # re-zero padding
            pad_ref[0:c_out, pad:pad + CORE] = y
            c_in = c_out

        # ---------- flatten in PyTorch NCL order (feature = c*L + l) --------
        for b in range(B):
            c0 = b * Lp + 2 * pad
            for c in range(n_channels):
                flat_ref[b:b + 1, c * L:(c + 1) * L] = pad_ref[c:c + 1, c0:c0 + L]

        x = flat_ref[...]                                         # (B, C*L)
        x = jnp.tanh(jnp.dot(x, projw_ref[...], preferred_element_type=f32)
                     + projb_ref[...])
        for i in range(n_bres):
            h = jnp.tanh(jnp.dot(x, bw1_ref[i], preferred_element_type=f32)
                         + bb1_ref[i])
            x = x + jnp.dot(h, bw2_ref[i], preferred_element_type=f32) + bb2_ref[i]
        branch_out = (jnp.dot(x, outw_ref[...], preferred_element_type=f32)
                      + outb_ref[...])                            # (B, 2p)

        # ---------- trunk ----------------------------------------------------
        ti = ti_ref[...]                                          # (Nc, 2)
        t = jnp.tanh(jnp.dot(ti, tinw_ref[...], preferred_element_type=f32)
                     + tinb_ref[...])
        for i in range(n_tres):
            h = jnp.tanh(jnp.dot(t, tw1_ref[i], preferred_element_type=f32)
                         + tb1_ref[i])
            t = t + jnp.dot(h, tw2_ref[i], preferred_element_type=f32) + tb2_ref[i]
        trunk_out = (jnp.dot(t, toutw_ref[...], preferred_element_type=f32)
                     + toutb_ref[...])                            # (Nc, 2p)

        # ---------- combine: fold r into the trunk factors (in-kernel exp) --
        r_col = 1.0 - jnp.exp(ti[:, 0:1] * (-1.0 / beta))         # (Nc, 1)
        t_u = trunk_out[:, :p] * r_col
        t_v = trunk_out[:, p:] * r_col
        b_u = branch_out[:, :p]
        b_v = branch_out[:, p:]
        dn = (((1,), (1,)), ((), ()))                             # contract dim 1 / dim 1
        u = lax.dot_general(b_u, t_u, dimension_numbers=dn,
                            preferred_element_type=f32)
        v = lax.dot_general(b_v, t_v, dimension_numbers=dn,
                            preferred_element_type=f32)
        u_ref[...] = u.astype(u_ref.dtype)
        v_ref[...] = v.astype(v_ref.dtype)

    return kernel, n_inputs


def conv_deeponet_forward(packed, branch_input, trunk_input, *, n_conv,
                          n_channels, kernel_size, n_bres, n_tres, p, beta=6.0):
    assert kernel_size % 2 == 1, "conv 'same' path assumes an odd kernel size"
    B = branch_input.shape[0]
    Nc = trunk_input.shape[0]
    L = L_SIGNAL
    pad = kernel_size // 2
    Lp = L + 2 * pad
    E = B * Lp + 2 * pad
    c_max = max(3, n_channels)

    kernel, n_inputs = _build_fused_kernel(
        B=B, n_conv=n_conv, n_channels=n_channels, kernel_size=kernel_size,
        n_bres=n_bres, n_tres=n_tres, p=p, beta=beta)

    inputs = [branch_input, trunk_input, packed["valid_mask"]]
    for w, b in zip(packed["conv_w"], packed["conv_b"]):
        inputs += [w, b]
    inputs += [packed["proj_w"], packed["proj_b"],
               packed["bres_w1"], packed["bres_b1"],
               packed["bres_w2"], packed["bres_b2"],
               packed["out_w"], packed["out_b"],
               packed["tin_w"], packed["tin_b"],
               packed["tres_w1"], packed["tres_b1"],
               packed["tres_w2"], packed["tres_b2"],
               packed["tout_w"], packed["tout_b"]]
    assert len(inputs) == n_inputs

    # TODO(synk): at production batch sizes, grid over the batch rows with a
    # "parallel" axis (and split branch/trunk across the two v7x TensorCores);
    # at B=2 / Nc=8 everything fits a single VMEM-resident invocation.
    u, v = pl.pallas_call(
        kernel,
        out_shape=(jax.ShapeDtypeStruct((B, Nc), jnp.float32),
                   jax.ShapeDtypeStruct((B, Nc), jnp.float32)),
        in_specs=[_vmem_spec()] * n_inputs,
        out_specs=(_vmem_spec(), _vmem_spec()),
        scratch_shapes=[pltpu.VMEM((c_max, E), jnp.float32),         # padded conv slab
                        pltpu.VMEM((B, n_channels * L), jnp.float32)],  # flatten buffer
    )(*inputs)
    return u, v


# ----------------------------------------------------------------------------
# Parameter init (PyTorch-style uniform fan-in) + packing into kernel layout
# ----------------------------------------------------------------------------

def _init_linear(key, fan_in, fan_out):
    k1, k2 = jax.random.split(key)
    bound = 1.0 / jnp.sqrt(fan_in)
    w = jax.random.uniform(k1, (fan_in, fan_out), jnp.float32, -bound, bound)
    b = jax.random.uniform(k2, (1, fan_out), jnp.float32, -bound, bound)
    return w, b


def _init_conv(key, c_in, c_out, ksize):
    k1, k2 = jax.random.split(key)
    bound = 1.0 / jnp.sqrt(c_in * ksize)
    w = jax.random.uniform(k1, (c_out, c_in, ksize), jnp.float32, -bound, bound)
    b = jax.random.uniform(k2, (c_out,), jnp.float32, -bound, bound)
    return w, b


def init_params(key, n_conv, n_channels, kernel_size, n_branch_res, n_trunk_res, p):
    params = {}
    width = 2 * p
    n_hidden = 256
    keys = iter(jax.random.split(key, 64))

    params["conv"] = []
    for i in range(n_conv):
        c_in = 3 if i == 0 else n_channels
        params["conv"].append(_init_conv(next(keys), c_in, n_channels, kernel_size))

    params["fc_proj"] = _init_linear(next(keys), n_channels * L_SIGNAL, width)
    params["branch_res"] = []
    for _ in range(n_branch_res):
        w1, b1 = _init_linear(next(keys), width, width)
        w2, b2 = _init_linear(next(keys), width, width)
        params["branch_res"].append((w1, b1, w2, b2))
    params["fc_out"] = _init_linear(next(keys), width, width)

    params["trunk_in"] = _init_linear(next(keys), 2, n_hidden)
    params["trunk_res"] = []
    for _ in range(n_trunk_res):
        w1, b1 = _init_linear(next(keys), n_hidden, n_hidden)
        w2, b2 = _init_linear(next(keys), n_hidden, n_hidden)
        params["trunk_res"].append((w1, b1, w2, b2))
    params["trunk_out"] = _init_linear(next(keys), n_hidden, width)
    return params


def pack_params(params, *, B, kernel_size):
    """One-time restructuring of the weights into the fused-kernel layout."""
    L = L_SIGNAL
    K = kernel_size
    pad = K // 2
    Lp = L + 2 * pad
    core = B * Lp

    packed = {}
    conv_w, conv_b = [], []
    for w, b in params["conv"]:                 # w: (C_out, C_in, K), b: (C_out,)
        c_out, c_in, _ = w.shape
        # row (k*C_out + o) holds w[o, :, k] -> easy static slicing per tap k
        conv_w.append(jnp.transpose(w, (2, 0, 1)).reshape(K * c_out, c_in))
        conv_b.append(b.reshape(c_out, 1))
    packed["conv_w"], packed["conv_b"] = conv_w, conv_b

    j = jnp.arange(core) % Lp
    packed["valid_mask"] = (
        ((j >= pad) & (j < pad + L)).astype(jnp.float32).reshape(1, core))

    def stack_res(blocks, width):
        if not blocks:
            zw = jnp.zeros((1, width, width), jnp.float32)
            zb = jnp.zeros((1, 1, width), jnp.float32)
            return zw, zb, zw, zb
        return (jnp.stack([blk[0] for blk in blocks]),
                jnp.stack([blk[1] for blk in blocks]),
                jnp.stack([blk[2] for blk in blocks]),
                jnp.stack([blk[3] for blk in blocks]))

    width = params["fc_out"][0].shape[0]
    n_hidden = params["trunk_in"][0].shape[1]

    packed["proj_w"], packed["proj_b"] = params["fc_proj"]
    (packed["bres_w1"], packed["bres_b1"],
     packed["bres_w2"], packed["bres_b2"]) = stack_res(params["branch_res"], width)
    packed["out_w"], packed["out_b"] = params["fc_out"]
    packed["tin_w"], packed["tin_b"] = params["trunk_in"]
    (packed["tres_w1"], packed["tres_b1"],
     packed["tres_w2"], packed["tres_b2"]) = stack_res(params["trunk_res"], n_hidden)
    packed["tout_w"], packed["tout_b"] = params["trunk_out"]
    return packed


# ----------------------------------------------------------------------------
# Pure-JAX reference (mirrors the PyTorch forward) for correctness checking
# ----------------------------------------------------------------------------

def _reference_forward(params, branch_input, trunk_input, p, beta=6.0):
    B = branch_input.shape[0]
    y_coords = jnp.broadcast_to(
        jnp.linspace(0.0, 1.0, L_SIGNAL, dtype=branch_input.dtype), (B, L_SIGNAL))
    x = jnp.stack((branch_input[:, :L_SIGNAL], branch_input[:, L_SIGNAL:],
                   y_coords), axis=1)
    for (w, b) in params["conv"]:
        x = jax.lax.conv_general_dilated(
            x, w, window_strides=(1,), padding=[(w.shape[2] // 2,) * 2],
            dimension_numbers=("NCH", "OIH", "NCH"))
        x = jnp.tanh(x + b.reshape(1, -1, 1))
    x = x.reshape(B, -1)
    x = jnp.tanh(x @ params["fc_proj"][0] + params["fc_proj"][1])
    for (w1, b1, w2, b2) in params["branch_res"]:
        x = x + (jnp.tanh(x @ w1 + b1) @ w2 + b2)
    branch_out = x @ params["fc_out"][0] + params["fc_out"][1]

    t = jnp.tanh(trunk_input @ params["trunk_in"][0] + params["trunk_in"][1])
    for (w1, b1, w2, b2) in params["trunk_res"]:
        t = t + (jnp.tanh(t @ w1 + b1) @ w2 + b2)
    trunk_out = t @ params["trunk_out"][0] + params["trunk_out"][1]

    b_u, b_v = branch_out[:, :p], branch_out[:, p:]
    t_u, t_v = trunk_out[:, :p], trunk_out[:, p:]
    r = (1.0 - jnp.exp(-trunk_input[:, 0] / beta)).reshape(1, -1)
    return r * (b_u @ t_u.T), r * (b_v @ t_v.T)


# ----------------------------------------------------------------------------
# Main
# ----------------------------------------------------------------------------

if __name__ == "__main__":
    # Small config consistent with the module: branch input length is fixed at
    # 202 (= 2 * 101) by the model; trunk input is (Nc, 2).
    n_branch_conv = 2
    n_branch_channels = 4
    kernel_size = 5
    n_branch_residual = 2
    n_trunk_residual = 2
    p = 16
    B = 2
    Nc = 8

    key = jax.random.PRNGKey(0)
    k_param, k_branch, k_trunk = jax.random.split(key, 3)
    params = init_params(k_param, n_branch_conv, n_branch_channels, kernel_size,
                         n_branch_residual, n_trunk_residual, p)
    packed = pack_params(params, B=B, kernel_size=kernel_size)

    branch_input = jax.random.normal(k_branch, (B, 2 * L_SIGNAL), jnp.float32)
    trunk_input = jax.random.uniform(k_trunk, (Nc, 2), jnp.float32)

    fwd = jax.jit(functools.partial(
        conv_deeponet_forward,
        n_conv=n_branch_conv, n_channels=n_branch_channels,
        kernel_size=kernel_size, n_bres=n_branch_residual,
        n_tres=n_trunk_residual, p=p))

    u, v = fwd(packed, branch_input, trunk_input)
    jax.block_until_ready((u, v))

    # Correctness check against the pure-JAX reference.
    u_ref, v_ref = _reference_forward(params, branch_input, trunk_input, p)
    assert u.shape == (B, Nc) and v.shape == (B, Nc)
    assert jnp.allclose(u, u_ref, atol=2e-4, rtol=2e-4)
    assert jnp.allclose(v, v_ref, atol=2e-4, rtol=2e-4)

    print("KERNEL_OK")
</pallas_src>

<mosaic_0001>
module attributes {stable_mosaic.version = 11 : i64} {
  func.func @kernel(%arg0: memref<2x202xf32, #tpu.memory_space<vmem>>, %arg1: memref<8x2xf32, #tpu.memory_space<vmem>>, %arg2: memref<1x210xf32, #tpu.memory_space<vmem>>, %arg3: memref<20x3xf32, #tpu.memory_space<vmem>>, %arg4: memref<4x1xf32, #tpu.memory_space<vmem>>, %arg5: memref<20x4xf32, #tpu.memory_space<vmem>>, %arg6: memref<4x1xf32, #tpu.memory_space<vmem>>, %arg7: memref<404x32xf32, #tpu.memory_space<vmem>>, %arg8: memref<1x32xf32, #tpu.memory_space<vmem>>, %arg9: memref<2x32x32xf32, #tpu.memory_space<vmem>>, %arg10: memref<2x1x32xf32, #tpu.memory_space<vmem>>, %arg11: memref<2x32x32xf32, #tpu.memory_space<vmem>>, %arg12: memref<2x1x32xf32, #tpu.memory_space<vmem>>, %arg13: memref<32x32xf32, #tpu.memory_space<vmem>>, %arg14: memref<1x32xf32, #tpu.memory_space<vmem>>, %arg15: memref<2x256xf32, #tpu.memory_space<vmem>>, %arg16: memref<1x256xf32, #tpu.memory_space<vmem>>, %arg17: memref<2x256x256xf32, #tpu.memory_space<vmem>>, %arg18: memref<2x1x256xf32, #tpu.memory_space<vmem>>, %arg19: memref<2x256x256xf32, #tpu.memory_space<vmem>>, %arg20: memref<2x1x256xf32, #tpu.memory_space<vmem>>, %arg21: memref<256x32xf32, #tpu.memory_space<vmem>>, %arg22: memref<1x32xf32, #tpu.memory_space<vmem>>, %arg23: memref<2x8xf32, #tpu.memory_space<vmem>>, %arg24: memref<2x8xf32, #tpu.memory_space<vmem>>, %arg25: memref<4x214xf32, #tpu.memory_space<vmem>>, %arg26: memref<2x404xf32, #tpu.memory_space<vmem>>) attributes {dimension_semantics = [], scalar_prefetch = 0 : i64, scratch_operands = 2 : i64, tpu.core_type = #tpu.core_type<tc>} {
    %cst = arith.constant 0.000000e+00 : f32
    %0 = vector.broadcast %cst : f32 to vector<4x214xf32>
    %c0 = arith.constant 0 : index
    %c0_0 = arith.constant 0 : index
    %1 = vector.load %arg25[%c0, %c0_0] : memref<4x214xf32, #tpu.memory_space<vmem>>, vector<4x214xf32>
    tpu.vector_store %arg25[%c0, %c0_0], %0 {strides = array<i32>} : memref<4x214xf32, #tpu.memory_space<vmem>>, vector<4x214xf32>,
    %2 = tpu.iota {dimensions = array<i32: 1>} : vector<1x101xi32>
    %3 = arith.sitofp %2 : vector<1x101xi32> to vector<1x101xf32>
    %cst_1 = arith.constant 0.00999999977 : f32
    %4 = vector.broadcast %cst_1 : f32 to vector<1x101xf32>
    %5 = arith.mulf %3, %4 : vector<1x101xf32>
    %c0_2 = arith.constant 0 : index
    %c0_3 = arith.constant 0 : index
    %6 = vector.load %arg0[%c0_2, %c0_3] : memref<2x202xf32, #tpu.memory_space<vmem>>, vector<1x101xf32>
    %c0_4 = arith.constant 0 : index
    %c4 = arith.constant 4 : index
    %7 = vector.load %arg25[%c0_4, %c4] : memref<4x214xf32, #tpu.memory_space<vmem>>, vector<1x101xf32>
    tpu.vector_store %arg25[%c0_4, %c4], %6 {strides = array<i32>} : memref<4x214xf32, #tpu.memory_space<vmem>>, vector<1x101xf32>,
    %c0_5 = arith.constant 0 : index
    %c101 = arith.constant 101 : index
    %8 = vector.load %arg0[%c0_5, %c101] : memref<2x202xf32, #tpu.memory_space<vmem>>, vector<1x101xf32>
    %c1 = arith.constant 1 : index
    %c4_6 = arith.constant 4 : index
    %9 = vector.load %arg25[%c1, %c4_6] : memref<4x214xf32, #tpu.memory_space<vmem>>, vector<1x101xf32>
    tpu.vector_store %arg25[%c1, %c4_6], %8 {strides = array<i32>} : memref<4x214xf32, #tpu.memory_space<vmem>>, vector<1x101xf32>,
    %c2 = arith.constant 2 : index
    %c4_7 = arith.constant 4 : index
    %10 = vector.load %arg25[%c2, %c4_7] : memref<4x214xf32, #tpu.memory_space<vmem>>, vector<1x101xf32>
    tpu.vector_store %arg25[%c2, %c4_7], %5 {strides = array<i32>} : memref<4x214xf32, #tpu.memory_space<vmem>>, vector<1x101xf32>,
    %c1_8 = arith.constant 1 : index
    %c0_9 = arith.constant 0 : index
    %11 = vector.load %arg0[%c1_8, %c0_9] : memref<2x202xf32, #tpu.memory_space<vmem>>, vector<1x101xf32>
    %c0_10 = arith.constant 0 : index
    %c109 = arith.constant 109 : index
    %12 = vector.load %arg25[%c0_10, %c109] : memref<4x214xf32, #tpu.memory_space<vmem>>, vector<1x101xf32>
    tpu.vector_store %arg25[%c0_10, %c109], %11 {strides = array<i32>} : memref<4x214xf32, #tpu.memory_space<vmem>>, vector<1x101xf32>,
    %c1_11 = arith.constant 1 : index
    %c101_12 = arith.constant 101 : index
    %13 = vector.load %arg0[%c1_11, %c101_12] : memref<2x202xf32, #tpu.memory_space<vmem>>, vector<1x101xf32>
    %c1_13 = arith.constant 1 : index
    %c109_14 = arith.constant 109 : index
    %14 = vector.load %arg25[%c1_13, %c109_14] : memref<4x214xf32, #tpu.memory_space<vmem>>, vector<1x101xf32>
    tpu.vector_store %arg25[%c1_13, %c109_14], %13 {strides = array<i32>} : memref<4x214xf32, #tpu.memory_space<vmem>>, vector<1x101xf32>,
    %c2_15 = arith.constant 2 : index
    %c109_16 = arith.constant 109 : index
    %15 = vector.load %arg25[%c2_15, %c109_16] : memref<4x214xf32, #tpu.memory_space<vmem>>, vector<1x101xf32>
    tpu.vector_store %arg25[%c2_15, %c109_16], %5 {strides = array<i32>} : memref<4x214xf32, #tpu.memory_space<vmem>>, vector<1x101xf32>,
    %c0_17 = arith.constant 0 : index
    %c0_18 = arith.constant 0 : index
    %16 = vector.load %arg2[%c0_17, %c0_18] : memref<1x210xf32, #tpu.memory_space<vmem>>, vector<1x210xf32>
    %c0_19 = arith.constant 0 : index
    %c0_20 = arith.constant 0 : index
    %17 = vector.load %arg25[%c0_19, %c0_20] : memref<4x214xf32, #tpu.memory_space<vmem>>, vector<3x214xf32>
    %cst_21 = arith.constant 0.000000e+00 : f32
    %18 = vector.broadcast %cst_21 : f32 to vector<4x210xf32>
    %c0_22 = arith.constant 0 : index
    %c0_23 = arith.constant 0 : index
    %19 = vector.load %arg3[%c0_22, %c0_23] : memref<20x3xf32, #tpu.memory_space<vmem>>, vector<4x3xf32>
    %20 = vector.extract_strided_slice %17 {offsets = [0, 0], sizes = [3, 210], strides = [1, 1]} : vector<3x214xf32> to vector<3x210xf32>
    %cst_24 = arith.constant dense<0.000000e+00> : vector<4x210xf32>
    %21 = tpu.matmul %19, %20, %cst_24 {dimension_numbers = #tpu.dot_dimension_numbers<[1], [0], [0], [1], [0, 0, 1, 1], [], []>} : vector<4x3xf32>, vector<3x210xf32>, vector<4x210xf32> -> vector<4x210xf32>
    %22 = arith.addf %18, %21 : vector<4x210xf32>
    %c4_25 = arith.constant 4 : index
    %c0_26 = arith.constant 0 : index
    %23 = vector.load %arg3[%c4_25, %c0_26] : memref<20x3xf32, #tpu.memory_space<vmem>>, vector<4x3xf32>
    %24 = vector.extract_strided_slice %17 {offsets = [0, 1], sizes = [3, 210], strides = [1, 1]} : vector<3x214xf32> to vector<3x210xf32>
    %cst_27 = arith.constant dense<0.000000e+00> : vector<4x210xf32>
    %25 = tpu.matmul %23, %24, %cst_27 {dimension_numbers = #tpu.dot_dimension_numbers<[1], [0], [0], [1], [0, 0, 1, 1], [], []>} : vector<4x3xf32>, vector<3x210xf32>, vector<4x210xf32> -> vector<4x210xf32>
    %26 = arith.addf %22, %25 : vector<4x210xf32>
    %c8 = arith.constant 8 : index
    %c0_28 = arith.constant 0 : index
    %27 = vector.load %arg3[%c8, %c0_28] : memref<20x3xf32, #tpu.memory_space<vmem>>, vector<4x3xf32>
    %28 = vector.extract_strided_slice %17 {offsets = [0, 2], sizes = [3, 210], strides = [1, 1]} : vector<3x214xf32> to vector<3x210xf32>
    %cst_29 = arith.constant dense<0.000000e+00> : vector<4x210xf32>
    %29 = tpu.matmul %27, %28, %cst_29 {dimension_numbers = #tpu.dot_dimension_numbers<[1], [0], [0], [1], [0, 0, 1, 1], [], []>} : vector<4x3xf32>, vector<3x210xf32>, vector<4x210xf32> -> vector<4x210xf32>
    %30 = arith.addf %26, %29 : vector<4x210xf32>
    %c12 = arith.constant 12 : index
    %c0_30 = arith.constant 0 : index
    %31 = vector.load %arg3[%c12, %c0_30] : memref<20x3xf32, #tpu.memory_space<vmem>>, vector<4x3xf32>
    %32 = vector.extract_strided_slice %17 {offsets = [0, 3], sizes = [3, 210], strides = [1, 1]} : vector<3x214xf32> to vector<3x210xf32>
    %cst_31 = arith.constant dense<0.000000e+00> : vector<4x210xf32>
    %33 = tpu.matmul %31, %32, %cst_31 {dimension_numbers = #tpu.dot_dimension_numbers<[1], [0], [0], [1], [0, 0, 1, 1], [], []>} : vector<4x3xf32>, vector<3x210xf32>, vector<4x210xf32> -> vector<4x210xf32>
    %34 = arith.addf %30, %33 : vector<4x210xf32>
    %c16 = arith.constant 16 : index
    %c0_32 = arith.constant 0 : index
    %35 = vector.load %arg3[%c16, %c0_32] : memref<20x3xf32, #tpu.memory_space<vmem>>, vector<4x3xf32>
    %36 = vector.extract_strided_slice %17 {offsets = [0, 4], sizes = [3, 210], strides = [1, 1]} : vector<3x214xf32> to vector<3x210xf32>
    %cst_33 = arith.constant dense<0.000000e+00> : vector<4x210xf32>
    %37 = tpu.matmul %35, %36, %cst_33 {dimension_numbers = #tpu.dot_dimension_numbers<[1], [0], [0], [1], [0, 0, 1, 1], [], []>} : vector<4x3xf32>, vector<3x210xf32>, vector<4x210xf32> -> vector<4x210xf32>
    %38 = arith.addf %34, %37 : vector<4x210xf32>
    %c0_34 = arith.constant 0 : index
    %c0_35 = arith.constant 0 : index
    %39 = vector.load %arg4[%c0_34, %c0_35] : memref<4x1xf32, #tpu.memory_space<vmem>>, vector<4x1xf32>
    %40 = vector.broadcast %39 : vector<4x1xf32> to vector<4x210xf32>
    %41 = arith.addf %38, %40 : vector<4x210xf32>
    %42 = math.tanh %41 : vector<4x210xf32>
    %43 = vector.broadcast %16 : vector<1x210xf32> to vector<4x210xf32>
    %44 = arith.mulf %42, %43 : vector<4x210xf32>
    %c0_36 = arith.constant 0 : index
    %c2_37 = arith.constant 2 : index
    %45 = vector.load %arg25[%c0_36, %c2_37] : memref<4x214xf32, #tpu.memory_space<vmem>>, vector<4x210xf32>
    tpu.vector_store %arg25[%c0_36, %c2_37], %44 {strides = array<i32>} : memref<4x214xf32, #tpu.memory_space<vmem>>, vector<4x210xf32>,
    %c0_38 = arith.constant 0 : index
    %c0_39 = arith.constant 0 : index
    %46 = vector.load %arg25[%c0_38, %c0_39] : memref<4x214xf32, #tpu.memory_space<vmem>>, vector<4x214xf32>
    %cst_40 = arith.constant 0.000000e+00 : f32
    %47 = vector.broadcast %cst_40 : f32 to vector<4x210xf32>
    %c0_41 = arith.constant 0 : index
    %c0_42 = arith.constant 0 : index
    %48 = vector.load %arg5[%c0_41, %c0_42] : memref<20x4xf32, #tpu.memory_space<vmem>>, vector<4x4xf32>
    %49 = vector.extract_strided_slice %46 {offsets = [0, 0], sizes = [4, 210], strides = [1, 1]} : vector<4x214xf32> to vector<4x210xf32>
    %cst_43 = arith.constant dense<0.000000e+00> : vector<4x210xf32>
    %50 = tpu.matmul %48, %49, %cst_43 {dimension_numbers = #tpu.dot_dimension_numbers<[1], [0], [0], [1], [0, 0, 1, 1], [], []>} : vector<4x4xf32>, vector<4x210xf32>, vector<4x210xf32> -> vector<4x210xf32>
    %51 = arith.addf %47, %50 : vector<4x210xf32>
    %c4_44 = arith.constant 4 : index
    %c0_45 = arith.constant 0 : index
    %52 = vector.load %arg5[%c4_44, %c0_45] : memref<20x4xf32, #tpu.memory_space<vmem>>, vector<4x4xf32>
    %53 = vector.extract_strided_slice %46 {offsets = [0, 1], sizes = [4, 210], strides = [1, 1]} : vector<4x214xf32> to vector<4x210xf32>
    %cst_46 = arith.constant dense<0.000000e+00> : vector<4x210xf32>
    %54 = tpu.matmul %52, %53, %cst_46 {dimension_numbers = #tpu.dot_dimension_numbers<[1], [0], [0], [1], [0, 0, 1, 1], [], []>} : vector<4x4xf32>, vector<4x210xf32>, vector<4x210xf32> -> vector<4x210xf32>
    %55 = arith.addf %51, %54 : vector<4x210xf32>
    %c8_47 = arith.constant 8 : index
    %c0_48 = arith.constant 0 : index
    %56 = vector.load %arg5[%c8_47, %c0_48] : memref<20x4xf32, #tpu.memory_space<vmem>>, vector<4x4xf32>
    %57 = vector.extract_strided_slice %46 {offsets = [0, 2], sizes = [4, 210], strides = [1, 1]} : vector<4x214xf32> to vector<4x210xf32>
    %cst_49 = arith.constant dense<0.000000e+00> : vector<4x210xf32>
    %58 = tpu.matmul %56, %57, %cst_49 {dimension_numbers = #tpu.dot_dimension_numbers<[1], [0], [0], [1], [0, 0, 1, 1], [], []>} : vector<4x4xf32>, vector<4x210xf32>, vector<4x210xf32> -> vector<4x210xf32>
    %59 = arith.addf %55, %58 : vector<4x210xf32>
    %c12_50 = arith.constant 12 : index
    %c0_51 = arith.constant 0 : index
    %60 = vector.load %arg5[%c12_50, %c0_51] : memref<20x4xf32, #tpu.memory_space<vmem>>, vector<4x4xf32>
    %61 = vector.extract_strided_slice %46 {offsets = [0, 3], sizes = [4, 210], strides = [1, 1]} : vector<4x214xf32> to vector<4x210xf32>
    %cst_52 = arith.constant dense<0.000000e+00> : vector<4x210xf32>
    %62 = tpu.matmul %60, %61, %cst_52 {dimension_numbers = #tpu.dot_dimension_numbers<[1], [0], [0], [1], [0, 0, 1, 1], [], []>} : vector<4x4xf32>, vector<4x210xf32>, vector<4x210xf32> -> vector<4x210xf32>
    %63 = arith.addf %59, %62 : vector<4x210xf32>
    %c16_53 = arith.constant 16 : index
    %c0_54 = arith.constant 0 : index
    %64 = vector.load %arg5[%c16_53, %c0_54] : memref<20x4xf32, #tpu.memory_space<vmem>>, vector<4x4xf32>
    %65 = vector.extract_strided_slice %46 {offsets = [0, 4], sizes = [4, 210], strides = [1, 1]} : vector<4x214xf32> to vector<4x210xf32>
    %cst_55 = arith.constant dense<0.000000e+00> : vector<4x210xf32>
    %66 = tpu.matmul %64, %65, %cst_55 {dimension_numbers = #tpu.dot_dimension_numbers<[1], [0], [0], [1], [0, 0, 1, 1], [], []>} : vector<4x4xf32>, vector<4x210xf32>, vector<4x210xf32> -> vector<4x210xf32>
    %67 = arith.addf %63, %66 : vector<4x210xf32>
    %c0_56 = arith.constant 0 : index
    %c0_57 = arith.constant 0 : index
    %68 = vector.load %arg6[%c0_56, %c0_57] : memref<4x1xf32, #tpu.memory_space<vmem>>, vector<4x1xf32>
    %69 = vector.broadcast %68 : vector<4x1xf32> to vector<4x210xf32>
    %70 = arith.addf %67, %69 : vector<4x210xf32>
    %71 = math.tanh %70 : vector<4x210xf32>
    %72 = vector.broadcast %16 : vector<1x210xf32> to vector<4x210xf32>
    %73 = arith.mulf %71, %72 : vector<4x210xf32>
    %c0_58 = arith.constant 0 : index
    %c2_59 = arith.constant 2 : index
    %74 = vector.load %arg25[%c0_58, %c2_59] : memref<4x214xf32, #tpu.memory_space<vmem>>, vector<4x210xf32>
    tpu.vector_store %arg25[%c0_58, %c2_59], %73 {strides = array<i32>} : memref<4x214xf32, #tpu.memory_space<vmem>>, vector<4x210xf32>,
    %c0_60 = arith.constant 0 : index
    %c4_61 = arith.constant 4 : index
    %75 = vector.load %arg25[%c0_60, %c4_61] : memref<4x214xf32, #tpu.memory_space<vmem>>, vector<1x101xf32>
    %c0_62 = arith.constant 0 : index
    %c0_63 = arith.constant 0 : index
    %76 = vector.load %arg26[%c0_62, %c0_63] : memref<2x404xf32, #tpu.memory_space<vmem>>, vector<1x101xf32>
    tpu.vector_store %arg26[%c0_62, %c0_63], %75 {strides = array<i32>} : memref<2x404xf32, #tpu.memory_space<vmem>>, vector<1x101xf32>,
    %c1_64 = arith.constant 1 : index
    %c4_65 = arith.constant 4 : index
    %77 = vector.load %arg25[%c1_64, %c4_65] : memref<4x214xf32, #tpu.memory_space<vmem>>, vector<1x101xf32>
    %c0_66 = arith.constant 0 : index
    %c101_67 = arith.constant 101 : index
    %78 = vector.load %arg26[%c0_66, %c101_67] : memref<2x404xf32, #tpu.memory_space<vmem>>, vector<1x101xf32>
    tpu.vector_store %arg26[%c0_66, %c101_67], %77 {strides = array<i32>} : memref<2x404xf32, #tpu.memory_space<vmem>>, vector<1x101xf32>,
    %c2_68 = arith.constant 2 : index
    %c4_69 = arith.constant 4 : index
    %79 = vector.load %arg25[%c2_68, %c4_69] : memref<4x214xf32, #tpu.memory_space<vmem>>, vector<1x101xf32>
    %c0_70 = arith.constant 0 : index
    %c202 = arith.constant 202 : index
    %80 = vector.load %arg26[%c0_70, %c202] : memref<2x404xf32, #tpu.memory_space<vmem>>, vector<1x101xf32>
    tpu.vector_store %arg26[%c0_70, %c202], %79 {strides = array<i32>} : memref<2x404xf32, #tpu.memory_space<vmem>>, vector<1x101xf32>,
    %c3 = arith.constant 3 : index
    %c4_71 = arith.constant 4 : index
    %81 = vector.load %arg25[%c3, %c4_71] : memref<4x214xf32, #tpu.memory_space<vmem>>, vector<1x101xf32>
    %c0_72 = arith.constant 0 : index
    %c303 = arith.constant 303 : index
    %82 = vector.load %arg26[%c0_72, %c303] : memref<2x404xf32, #tpu.memory_space<vmem>>, vector<1x101xf32>
    tpu.vector_store %arg26[%c0_72, %c303], %81 {strides = array<i32>} : memref<2x404xf32, #tpu.memory_space<vmem>>, vector<1x101xf32>,
    %c0_73 = arith.constant 0 : index
    %c109_74 = arith.constant 109 : index
    %83 = vector.load %arg25[%c0_73, %c109_74] : memref<4x214xf32, #tpu.memory_space<vmem>>, vector<1x101xf32>
    %c1_75 = arith.constant 1 : index
    %c0_76 = arith.constant 0 : index
    %84 = vector.load %arg26[%c1_75, %c0_76] : memref<2x404xf32, #tpu.memory_space<vmem>>, vector<1x101xf32>
    tpu.vector_store %arg26[%c1_75, %c0_76], %83 {strides = array<i32>} : memref<2x404xf32, #tpu.memory_space<vmem>>, vector<1x101xf32>,
    %c1_77 = arith.constant 1 : index
    %c109_78 = arith.constant 109 : index
    %85 = vector.load %arg25[%c1_77, %c109_78] : memref<4x214xf32, #tpu.memory_space<vmem>>, vector<1x101xf32>
    %c1_79 = arith.constant 1 : index
    %c101_80 = arith.constant 101 : index
    %86 = vector.load %arg26[%c1_79, %c101_80] : memref<2x404xf32, #tpu.memory_space<vmem>>, vector<1x101xf32>
    tpu.vector_store %arg26[%c1_79, %c101_80], %85 {strides = array<i32>} : memref<2x404xf32, #tpu.memory_space<vmem>>, vector<1x101xf32>,
    %c2_81 = arith.constant 2 : index
    %c109_82 = arith.constant 109 : index
    %87 = vector.load %arg25[%c2_81, %c109_82] : memref<4x214xf32, #tpu.memory_space<vmem>>, vector<1x101xf32>
    %c1_83 = arith.constant 1 : index
    %c202_84 = arith.constant 202 : index
    %88 = vector.load %arg26[%c1_83, %c202_84] : memref<2x404xf32, #tpu.memory_space<vmem>>, vector<1x101xf32>
    tpu.vector_store %arg26[%c1_83, %c202_84], %87 {strides = array<i32>} : memref<2x404xf32, #tpu.memory_space<vmem>>, vector<1x101xf32>,
    %c3_85 = arith.constant 3 : index
    %c109_86 = arith.constant 109 : index
    %89 = vector.load %arg25[%c3_85, %c109_86] : memref<4x214xf32, #tpu.memory_space<vmem>>, vector<1x101xf32>
    %c1_87 = arith.constant 1 : index
    %c303_88 = arith.constant 303 : index
    %90 = vector.load %arg26[%c1_87, %c303_88] : memref<2x404xf32, #tpu.memory_space<vmem>>, vector<1x101xf32>
    tpu.vector_store %arg26[%c1_87, %c303_88], %89 {strides = array<i32>} : memref<2x404xf32, #tpu.memory_space<vmem>>, vector<1x101xf32>,
    %c0_89 = arith.constant 0 : index
    %c0_90 = arith.constant 0 : index
    %91 = vector.load %arg26[%c0_89, %c0_90] : memref<2x404xf32, #tpu.memory_space<vmem>>, vector<2x404xf32>
    %c0_91 = arith.constant 0 : index
    %c0_92 = arith.constant 0 : index
    %92 = vector.load %arg7[%c0_91, %c0_92] : memref<404x32xf32, #tpu.memory_space<vmem>>, vector<404x32xf32>
    %cst_93 = arith.constant dense<0.000000e+00> : vector<2x32xf32>
    %93 = tpu.matmul %91, %92, %cst_93 {dimension_numbers = #tpu.dot_dimension_numbers<[1], [0], [0], [1], [0, 0, 1, 1], [], []>} : vector<2x404xf32>, vector<404x32xf32>, vector<2x32xf32> -> vector<2x32xf32>
    %c0_94 = arith.constant 0 : index
    %c0_95 = arith.constant 0 : index
    %94 = vector.load %arg8[%c0_94, %c0_95] : memref<1x32xf32, #tpu.memory_space<vmem>>, vector<1x32xf32>
    %95 = vector.broadcast %94 : vector<1x32xf32> to vector<2x32xf32>
    %96 = arith.addf %93, %95 : vector<2x32xf32>
    %97 = math.tanh %96 : vector<2x32xf32>
    %c0_96 = arith.constant 0 : index
    %c0_97 = arith.constant 0 : index
    %c0_98 = arith.constant 0 : index
    %98 = vector.load %arg9[%c0_96, %c0_97, %c0_98] : memref<2x32x32xf32, #tpu.memory_space<vmem>>, vector<1x32x32xf32>
    %99 = vector.shape_cast %98 : vector<1x32x32xf32> to vector<32x32xf32>
    %cst_99 = arith.constant dense<0.000000e+00> : vector<2x32xf32>
    %100 = tpu.matmul %97, %99, %cst_99 {dimension_numbers = #tpu.dot_dimension_numbers<[1], [0], [0], [1], [0, 0, 1, 1], [], []>} : vector<2x32xf32>, vector<32x32xf32>, vector<2x32xf32> -> vector<2x32xf32>
    %c0_100 = arith.constant 0 : index
    %c0_101 = arith.constant 0 : index
    %c0_102 = arith.constant 0 : index
    %101 = vector.load %arg10[%c0_100, %c0_101, %c0_102] : memref<2x1x32xf32, #tpu.memory_space<vmem>>, vector<1x1x32xf32>
    %102 = vector.shape_cast %101 : vector<1x1x32xf32> to vector<1x32xf32>
    %103 = vector.broadcast %102 : vector<1x32xf32> to vector<2x32xf32>
    %104 = arith.addf %100, %103 : vector<2x32xf32>
    %105 = math.tanh %104 : vector<2x32xf32>
    %c0_103 = arith.constant 0 : index
    %c0_104 = arith.constant 0 : index
    %c0_105 = arith.constant 0 : index
    %106 = vector.load %arg11[%c0_103, %c0_104, %c0_105] : memref<2x32x32xf32, #tpu.memory_space<vmem>>, vector<1x32x32xf32>
    %107 = vector.shape_cast %106 : vector<1x32x32xf32> to vector<32x32xf32>
    %cst_106 = arith.constant dense<0.000000e+00> : vector<2x32xf32>
    %108 = tpu.matmul %105, %107, %cst_106 {dimension_numbers = #tpu.dot_dimension_numbers<[1], [0], [0], [1], [0, 0, 1, 1], [], []>} : vector<2x32xf32>, vector<32x32xf32>, vector<2x32xf32> -> vector<2x32xf32>
    %109 = arith.addf %97, %108 : vector<2x32xf32>
    %c0_107 = arith.constant 0 : index
    %c0_108 = arith.constant 0 : index
    %c0_109 = arith.constant 0 : index
    %110 = vector.load %arg12[%c0_107, %c0_108, %c0_109] : memref<2x1x32xf32, #tpu.memory_space<vmem>>, vector<1x1x32xf32>
    %111 = vector.shape_cast %110 : vector<1x1x32xf32> to vector<1x32xf32>
    %112 = vector.broadcast %111 : vector<1x32xf32> to vector<2x32xf32>
    %113 = arith.addf %109, %112 : vector<2x32xf32>
    %c1_110 = arith.constant 1 : index
    %c0_111 = arith.constant 0 : index
    %c0_112 = arith.constant 0 : index
    %114 = vector.load %arg9[%c1_110, %c0_111, %c0_112] : memref<2x32x32xf32, #tpu.memory_space<vmem>>, vector<1x32x32xf32>
    %115 = vector.shape_cast %114 : vector<1x32x32xf32> to vector<32x32xf32>
    %cst_113 = arith.constant dense<0.000000e+00> : vector<2x32xf32>
    %116 = tpu.matmul %113, %115, %cst_113 {dimension_numbers = #tpu.dot_dimension_numbers<[1], [0], [0], [1], [0, 0, 1, 1], [], []>} : vector<2x32xf32>, vector<32x32xf32>, vector<2x32xf32> -> vector<2x32xf32>
    %c1_114 = arith.constant 1 : index
    %c0_115 = arith.constant 0 : index
    %c0_116 = arith.constant 0 : index
    %117 = vector.load %arg10[%c1_114, %c0_115, %c0_116] : memref<2x1x32xf32, #tpu.memory_space<vmem>>, vector<1x1x32xf32>
    %118 = vector.shape_cast %117 : vector<1x1x32xf32> to vector<1x32xf32>
    %119 = vector.broadcast %118 : vector<1x32xf32> to vector<2x32xf32>
    %120 = arith.addf %116, %119 : vector<2x32xf32>
    %121 = math.tanh %120 : vector<2x32xf32>
    %c1_117 = arith.constant 1 : index
    %c0_118 = arith.constant 0 : index
    %c0_119 = arith.constant 0 : index
    %122 = vector.load %arg11[%c1_117, %c0_118, %c0_119] : memref<2x32x32xf32, #tpu.memory_space<vmem>>, vector<1x32x32xf32>
    %123 = vector.shape_cast %122 : vector<1x32x32xf32> to vector<32x32xf32>
    %cst_120 = arith.constant dense<0.000000e+00> : vector<2x32xf32>
    %124 = tpu.matmul %121, %123, %cst_120 {dimension_numbers = #tpu.dot_dimension_numbers<[1], [0], [0], [1], [0, 0, 1, 1], [], []>} : vector<2x32xf32>, vector<32x32xf32>, vector<2x32xf32> -> vector<2x32xf32>
    %125 = arith.addf %113, %124 : vector<2x32xf32>
    %c1_121 = arith.constant 1 : index
    %c0_122 = arith.constant 0 : index
    %c0_123 = arith.constant 0 : index
    %126 = vector.load %arg12[%c1_121, %c0_122, %c0_123] : memref<2x1x32xf32, #tpu.memory_space<vmem>>, vector<1x1x32xf32>
    %127 = vector.shape_cast %126 : vector<1x1x32xf32> to vector<1x32xf32>
    %128 = vector.broadcast %127 : vector<1x32xf32> to vector<2x32xf32>
    %129 = arith.addf %125, %128 : vector<2x32xf32>
    %c0_124 = arith.constant 0 : index
    %c0_125 = arith.constant 0 : index
    %130 = vector.load %arg13[%c0_124, %c0_125] : memref<32x32xf32, #tpu.memory_space<vmem>>, vector<32x32xf32>
    %cst_126 = arith.constant dense<0.000000e+00> : vector<2x32xf32>
    %131 = tpu.matmul %129, %130, %cst_126 {dimension_numbers = #tpu.dot_dimension_numbers<[1], [0], [0], [1], [0, 0, 1, 1], [], []>} : vector<2x32xf32>, vector<32x32xf32>, vector<2x32xf32> -> vector<2x32xf32>
    %c0_127 = arith.constant 0 : index
    %c0_128 = arith.constant 0 : index
    %132 = vector.load %arg14[%c0_127, %c0_128] : memref<1x32xf32, #tpu.memory_space<vmem>>, vector<1x32xf32>
    %133 = vector.broadcast %132 : vector<1x32xf32> to vector<2x32xf32>
    %134 = arith.addf %131, %133 : vector<2x32xf32>
    %c0_129 = arith.constant 0 : index
    %c0_130 = arith.constant 0 : index
    %135 = vector.load %arg1[%c0_129, %c0_130] : memref<8x2xf32, #tpu.memory_space<vmem>>, vector<8x2xf32>
    %c0_131 = arith.constant 0 : index
    %c0_132 = arith.constant 0 : index
    %136 = vector.load %arg15[%c0_131, %c0_132] : memref<2x256xf32, #tpu.memory_space<vmem>>, vector<2x256xf32>
    %cst_133 = arith.constant dense<0.000000e+00> : vector<8x256xf32>
    %137 = tpu.matmul %135, %136, %cst_133 {dimension_numbers = #tpu.dot_dimension_numbers<[1], [0], [0], [1], [0, 0, 1, 1], [], []>} : vector<8x2xf32>, vector<2x256xf32>, vector<8x256xf32> -> vector<8x256xf32>
    %c0_134 = arith.constant 0 : index
    %c0_135 = arith.constant 0 : index
    %138 = vector.load %arg16[%c0_134, %c0_135] : memref<1x256xf32, #tpu.memory_space<vmem>>, vector<1x256xf32>
    %139 = vector.broadcast %138 : vector<1x256xf32> to vector<8x256xf32>
    %140 = arith.addf %137, %139 : vector<8x256xf32>
    %141 = math.tanh %140 : vector<8x256xf32>
    %c0_136 = arith.constant 0 : index
    %c0_137 = arith.constant 0 : index
    %c0_138 = arith.constant 0 : index
    %142 = vector.load %arg17[%c0_136, %c0_137, %c0_138] : memref<2x256x256xf32, #tpu.memory_space<vmem>>, vector<1x256x256xf32>
    %143 = vector.shape_cast %142 : vector<1x256x256xf32> to vector<256x256xf32>
    %cst_139 = arith.constant dense<0.000000e+00> : vector<8x256xf32>
    %144 = tpu.matmul %141, %143, %cst_139 {dimension_numbers = #tpu.dot_dimension_numbers<[1], [0], [0], [1], [0, 0, 1, 1], [], []>} : vector<8x256xf32>, vector<256x256xf32>, vector<8x256xf32> -> vector<8x256xf32>
    %c0_140 = arith.constant 0 : index
    %c0_141 = arith.constant 0 : index
    %c0_142 = arith.constant 0 : index
    %145 = vector.load %arg18[%c0_140, %c0_141, %c0_142] : memref<2x1x256xf32, #tpu.memory_space<vmem>>, vector<1x1x256xf32>
    %146 = vector.shape_cast %145 : vector<1x1x256xf32> to vector<1x256xf32>
    %147 = vector.broadcast %146 : vector<1x256xf32> to vector<8x256xf32>
    %148 = arith.addf %144, %147 : vector<8x256xf32>
    %149 = math.tanh %148 : vector<8x256xf32>
    %c0_143 = arith.constant 0 : index
    %c0_144 = arith.constant 0 : index
    %c0_145 = arith.constant 0 : index
    %150 = vector.load %arg19[%c0_143, %c0_144, %c0_145] : memref<2x256x256xf32, #tpu.memory_space<vmem>>, vector<1x256x256xf32>
    %151 = vector.shape_cast %150 : vector<1x256x256xf32> to vector<256x256xf32>
    %cst_146 = arith.constant dense<0.000000e+00> : vector<8x256xf32>
    %152 = tpu.matmul %149, %151, %cst_146 {dimension_numbers = #tpu.dot_dimension_numbers<[1], [0], [0], [1], [0, 0, 1, 1], [], []>} : vector<8x256xf32>, vector<256x256xf32>, vector<8x256xf32> -> vector<8x256xf32>
    %153 = arith.addf %141, %152 : vector<8x256xf32>
    %c0_147 = arith.constant 0 : index
    %c0_148 = arith.constant 0 : index
    %c0_149 = arith.constant 0 : index
    %154 = vector.load %arg20[%c0_147, %c0_148, %c0_149] : memref<2x1x256xf32, #tpu.memory_space<vmem>>, vector<1x1x256xf32>
    %155 = vector.shape_cast %154 : vector<1x1x256xf32> to vector<1x256xf32>
    %156 = vector.broadcast %155 : vector<1x256xf32> to vector<8x256xf32>
    %157 = arith.addf %153, %156 : vector<8x256xf32>
    %c1_150 = arith.constant 1 : index
    %c0_151 = arith.constant 0 : index
    %c0_152 = arith.constant 0 : index
    %158 = vector.load %arg17[%c1_150, %c0_151, %c0_152] : memref<2x256x256xf32, #tpu.memory_space<vmem>>, vector<1x256x256xf32>
    %159 = vector.shape_cast %158 : vector<1x256x256xf32> to vector<256x256xf32>
    %cst_153 = arith.constant dense<0.000000e+00> : vector<8x256xf32>
    %160 = tpu.matmul %157, %159, %cst_153 {dimension_numbers = #tpu.dot_dimension_numbers<[1], [0], [0], [1], [0, 0, 1, 1], [], []>} : vector<8x256xf32>, vector<256x256xf32>, vector<8x256xf32> -> vector<8x256xf32>
    %c1_154 = arith.constant 1 : index
    %c0_155 = arith.constant 0 : index
    %c0_156 = arith.constant 0 : index
    %161 = vector.load %arg18[%c1_154, %c0_155, %c0_156] : memref<2x1x256xf32, #tpu.memory_space<vmem>>, vector<1x1x256xf32>
    %162 = vector.shape_cast %161 : vector<1x1x256xf32> to vector<1x256xf32>
    %163 = vector.broadcast %162 : vector<1x256xf32> to vector<8x256xf32>
    %164 = arith.addf %160, %163 : vector<8x256xf32>
    %165 = math.tanh %164 : vector<8x256xf32>
    %c1_157 = arith.constant 1 : index
    %c0_158 = arith.constant 0 : index
    %c0_159 = arith.constant 0 : index
    %166 = vector.load %arg19[%c1_157, %c0_158, %c0_159] : memref<2x256x256xf32, #tpu.memory_space<vmem>>, vector<1x256x256xf32>
    %167 = vector.shape_cast %166 : vector<1x256x256xf32> to vector<256x256xf32>
    %cst_160 = arith.constant dense<0.000000e+00> : vector<8x256xf32>
    %168 = tpu.matmul %165, %167, %cst_160 {dimension_numbers = #tpu.dot_dimension_numbers<[1], [0], [0], [1], [0, 0, 1, 1], [], []>} : vector<8x256xf32>, vector<256x256xf32>, vector<8x256xf32> -> vector<8x256xf32>
    %169 = arith.addf %157, %168 : vector<8x256xf32>
    %c1_161 = arith.constant 1 : index
    %c0_162 = arith.constant 0 : index
    %c0_163 = arith.constant 0 : index
    %170 = vector.load %arg20[%c1_161, %c0_162, %c0_163] : memref<2x1x256xf32, #tpu.memory_space<vmem>>, vector<1x1x256xf32>
    %171 = vector.shape_cast %170 : vector<1x1x256xf32> to vector<1x256xf32>
    %172 = vector.broadcast %171 : vector<1x256xf32> to vector<8x256xf32>
    %173 = arith.addf %169, %172 : vector<8x256xf32>
    %c0_164 = arith.constant 0 : index
    %c0_165 = arith.constant 0 : index
    %174 = vector.load %arg21[%c0_164, %c0_165] : memref<256x32xf32, #tpu.memory_space<vmem>>, vector<256x32xf32>
    %cst_166 = arith.constant dense<0.000000e+00> : vector<8x32xf32>
    %175 = tpu.matmul %173, %174, %cst_166 {dimension_numbers = #tpu.dot_dimension_numbers<[1], [0], [0], [1], [0, 0, 1, 1], [], []>} : vector<8x256xf32>, vector<256x32xf32>, vector<8x32xf32> -> vector<8x32xf32>
    %c0_167 = arith.constant 0 : index
    %c0_168 = arith.constant 0 : index
    %176 = vector.load %arg22[%c0_167, %c0_168] : memref<1x32xf32, #tpu.memory_space<vmem>>, vector<1x32xf32>
    %177 = vector.broadcast %176 : vector<1x32xf32> to vector<8x32xf32>
    %178 = arith.addf %175, %177 : vector<8x32xf32>
    %179 = vector.extract_strided_slice %135 {offsets = [0, 0], sizes = [8, 1], strides = [1, 1]} : vector<8x2xf32> to vector<8x1xf32>
    %cst_169 = arith.constant -0.166666672 : f32
    %180 = vector.broadcast %cst_169 : f32 to vector<8x1xf32>
    %181 = arith.mulf %179, %180 : vector<8x1xf32>
    %182 = math.exp %181 : vector<8x1xf32>
    %cst_170 = arith.constant 1.000000e+00 : f32
    %183 = vector.broadcast %cst_170 : f32 to vector<8x1xf32>
    %184 = arith.subf %183, %182 : vector<8x1xf32>
    %185 = vector.extract_strided_slice %178 {offsets = [0, 0], sizes = [8, 16], strides = [1, 1]} : vector<8x32xf32> to vector<8x16xf32>
    %186 = vector.broadcast %184 : vector<8x1xf32> to vector<8x16xf32>
    %187 = arith.mulf %185, %186 : vector<8x16xf32>
    %188 = vector.extract_strided_slice %178 {offsets = [0, 16], sizes = [8, 16], strides = [1, 1]} : vector<8x32xf32> to vector<8x16xf32>
    %189 = vector.broadcast %184 : vector<8x1xf32> to vector<8x16xf32>
    %190 = arith.mulf %188, %189 : vector<8x16xf32>
    %191 = vector.extract_strided_slice %134 {offsets = [0, 0], sizes = [2, 16], strides = [1, 1]} : vector<2x32xf32> to vector<2x16xf32>
    %192 = vector.extract_strided_slice %134 {offsets = [0, 16], sizes = [2, 16], strides = [1, 1]} : vector<2x32xf32> to vector<2x16xf32>
    %cst_171 = arith.constant dense<0.000000e+00> : vector<2x8xf32>
    %193 = tpu.matmul %191, %187, %cst_171 {dimension_numbers = #tpu.dot_dimension_numbers<[1], [1], [0], [0], [0, 0, 1, 0], [], []>} : vector<2x16xf32>, vector<8x16xf32>, vector<2x8xf32> -> vector<2x8xf32>
    %cst_172 = arith.constant dense<0.000000e+00> : vector<2x8xf32>
    %194 = tpu.matmul %192, %190, %cst_172 {dimension_numbers = #tpu.dot_dimension_numbers<[1], [1], [0], [0], [0, 0, 1, 0], [], []>} : vector<2x16xf32>, vector<8x16xf32>, vector<2x8xf32> -> vector<2x8xf32>
    %c0_173 = arith.constant 0 : index
    %c0_174 = arith.constant 0 : index
    %195 = vector.load %arg23[%c0_173, %c0_174] : memref<2x8xf32, #tpu.memory_space<vmem>>, vector<2x8xf32>
    tpu.vector_store %arg23[%c0_173, %c0_174], %193 {strides = array<i32>} : memref<2x8xf32, #tpu.memory_space<vmem>>, vector<2x8xf32>,
    %c0_175 = arith.constant 0 : index
    %c0_176 = arith.constant 0 : index
    %196 = vector.load %arg24[%c0_175, %c0_176] : memref<2x8xf32, #tpu.memory_space<vmem>>, vector<2x8xf32>
    tpu.vector_store %arg24[%c0_175, %c0_176], %194 {strides = array<i32>} : memref<2x8xf32, #tpu.memory_space<vmem>>, vector<2x8xf32>,
    return
  }
}

</mosaic_0001>

<bundles_post_ra>
// kernel: conv_deeponet_forward.1
= control target key start
LH: loop header
LB: loop body
LE: loop exit
PB: predicated region body
PF: predicated region fallthrough
CT: control target
= control target key end

     0   :  { %s4503_s0 = inlined_call_operand.vmem [shape: f32[2,202], index: 0, kind: input, shape index: {}]   ;;  %s4504_s1 = inlined_call_operand.vmem [shape: f32[8,2], index: 1, kind: input, shape index: {}]   ;;  %s4505_s2 = inlined_call_operand.vmem [shape: f32[1,210], index: 2, kind: input, shape index: {}]   ;;  %s4506_s3 = inlined_call_operand.vmem [shape: f32[20,3], index: 3, kind: input, shape index: {}]   ;;  %s4507_s4 = inlined_call_operand.vmem [shape: f32[4,1], index: 4, kind: input, shape index: {}]   ;;  %s4508_s5 = inlined_call_operand.vmem [shape: f32[20,4], index: 5, kind: input, shape index: {}]   ;;  %s4509_s6 = inlined_call_operand.vmem [shape: f32[4,1], index: 6, kind: input, shape index: {}]   ;;  %s4510_s7 = inlined_call_operand.vmem [shape: f32[404,32], index: 7, kind: input, shape index: {}]   ;;  %s4511_s8 = inlined_call_operand.vmem [shape: f32[1,32], index: 8, kind: input, shape index: {}]   ;;  %s4512_s9 = inlined_call_operand.vmem [shape: f32[2,32,32], index: 9, kind: input, shape index: {}]   ;;  %s4513_s10 = inlined_call_operand.vmem [shape: f32[2,1,32], index: 10, kind: input, shape index: {}]   ;;  %s4514_s11 = inlined_call_operand.vmem [shape: f32[2,32,32], index: 11, kind: input, shape index: {}]   ;;  %s4515_s12 = inlined_call_operand.vmem [shape: f32[2,1,32], index: 12, kind: input, shape index: {}]   ;;  %s4516_s13 = inlined_call_operand.vmem [shape: f32[32,32], index: 13, kind: input, shape index: {}]   ;;  %s4517_s14 = inlined_call_operand.vmem [shape: f32[1,32], index: 14, kind: input, shape index: {}]   ;;  %s4518_s15 = inlined_call_operand.vmem [shape: f32[2,256], index: 15, kind: input, shape index: {}]   ;;  %s4519_s16 = inlined_call_operand.vmem [shape: f32[1,256], index: 16, kind: input, shape index: {}]   ;;  %s4520_s17 = inlined_call_operand.hbm [shape: f32[2,256,256], index: 17, kind: input, shape index: {}]   ;;  %s4521_s18 = inlined_call_operand.vmem [shape: f32[2,1,256], index: 18, kind: input, shape index: {}]   ;;  %s4522_s19 = inlined_call_operand.hbm [shape: f32[2,256,256], index: 19, kind: input, shape index: {}]   ;;  %s4523_s20 = inlined_call_operand.vmem [shape: f32[2,1,256], index: 20, kind: input, shape index: {}]   ;;  %s4524_s21 = inlined_call_operand.vmem [shape: f32[256,32], index: 21, kind: input, shape index: {}]   ;;  %s4525_s22 = inlined_call_operand.vmem [shape: f32[1,32], index: 22, kind: input, shape index: {}]   ;;  %s4526_s23 = inlined_call_operand.hbm [shape: f32[2,8], index: 23, kind: output, shape index: {0}]   ;;  %s4527_s24 = inlined_call_operand.hbm [shape: f32[2,8], index: 24, kind: output, shape index: {1}]  }
   0x1   :  { %4532 = sst [smem:[#allocation16_spill]] %s4503_s0 }
   0x2   :  { %4533 = sst [smem:[#allocation17_spill]] %s4504_s1 }
   0x3   :  { %4534 = sst [smem:[#allocation18_spill]] %s4505_s2 }
   0x4   :  { %4535 = sst [smem:[#allocation19_spill]] %s4506_s3 }
   0x5   :  { %4536 = sst [smem:[#allocation20_spill]] %s4507_s4 }
   0x6   :  { %4537 = sst [smem:[#allocation21_spill]] %s4508_s5 }
   0x7   :  { %4538 = sst [smem:[#allocation22_spill]] %s4509_s6 }
   0x8   :  { %4539 = sst [smem:[#allocation23_spill]] %s4510_s7 }
   0x9   :  { %4540 = sst [smem:[#allocation24_spill]] %s4511_s8 }
   0xa   :  { %30 = vsyncpa [#allocation5], 0 }
   0xb   :  { %31 = vsyncpa [#allocation8], 0 }
   0xc   :  { %32 = vsyncpa [#allocation6], 0 }
   0xd   :  { %33 = vsyncpa [#allocation11], 0  ;;  %s3698_s5 = smov [#allocation4]   ;;  %s3602_s6 = scalar_lea.hbm %s4520_s17, 16384 }
   0xe   :  { %s73_s26 = sshll.u32 %s3698_s5, 4  ;;  %p3603_p0 = scmp.ne.s32.totalorder %s4520_s17, %s3602_s6  ;;  %s74_s26 = int_to_ptr.vmem [resolvable:$true] %s73_s26 }
   0xf   :  { %p3606_p1 = scmp.lt.u32.totalorder %s3602_s6, %s4520_s17 }
  0x11   :  { %p3608_p2 = pnand %p3606_p1, %p3603_p0 }
  0x13   :  { %3611 = shalt.err (!%p3608_p2)
}
  0x14   :  { %s3612_s30 = scalar_lea.vmem %s74_s26, 16384  ;;  %p3617_p4 = scmp.lt.s32.totalorder %s74_s26, %s74_s26 }
  0x15   :  { %p3613_p3 = scmp.ne.s32.totalorder %s74_s26, %s3612_s30  ;;  %p3618_p5 = scmp.lt.s32.totalorder %s3612_s30, %s3612_s30 }
  0x17   :  { %p3619_p6 = por %p3618_p5, %p3617_p4 }
  0x19   :  { %p3620_p7 = pnand %p3619_p6, %p3613_p3 }
  0x1b   :  { %3623 = shalt.err (!%p3620_p7)
}
  0x1c   :  { %s3699_s3 = smov 256   ;;  %s3700_s25 = smov 16  }
  0x1d   :  { %79 = dma.hbm_to_vmem [thread:$0]  %s4520_s17, 16384, %s74_s26, [#allocation5], %s3699_s3, %s3699_s3, %s3700_s25  }
  0x1e   :  { %s3701_s1 = smov [#allocation7]   ;;  %s3624_s6 = scalar_lea.hbm %s4522_s19, 16384 }
  0x1f   :  { %s87_s5 = sshll.u32 %s3701_s1, 4  ;;  %p3625_p8 = scmp.ne.s32.totalorder %s4522_s19, %s3624_s6  ;;  %s88_s5 = int_to_ptr.vmem [resolvable:$true] %s87_s5 }
  0x20   :  { %p3628_p9 = scmp.lt.u32.totalorder %s3624_s6, %s4522_s19 }
  0x22   :  { %p3630_p10 = pnand %p3628_p9, %p3625_p8 }
  0x24   :  { %3633 = shalt.err (!%p3630_p10)
}
  0x25   :  { %s3634_s30 = scalar_lea.vmem %s88_s5, 16384  ;;  %p3639_p12 = scmp.lt.s32.totalorder %s88_s5, %s88_s5 }
  0x26   :  { %p3635_p11 = scmp.ne.s32.totalorder %s88_s5, %s3634_s30  ;;  %p3640_p13 = scmp.lt.s32.totalorder %s3634_s30, %s3634_s30 }
  0x28   :  { %p3641_p0 = por %p3640_p13, %p3639_p12 }
  0x2a   :  { %p3642_p1 = pnand %p3641_p0, %p3635_p11 }
  0x2c   :  { %3645 = shalt.err (!%p3642_p1)
}
  0x2d   :  { %93 = dma.hbm_to_vmem [thread:$0]  %s4522_s19, 16384, %s88_s5, [#allocation8], %s3699_s3, %s3699_s3, %s3700_s25  }
  0x2e   :  { %3690 = dma.done.wait [#allocation5], 16384  }
  0x2f   :  { %3691 = vsyncadd [#allocation5], 4294950912 }
  0x30   :  { %3692 = dma.done.wait [#allocation8], 16384  }
  0x31   :  { %3693 = vsyncadd [#allocation8], 4294950912  ;;  %v110_v0 = vlaneseq  ;;  %v3702_v1 = vmov 572653568   ;;  %vm106_vm0 = vcmask 1043456   ;;  %vm107_vm1 = vcmask 703492   ;;  %s4541_s25 = sld [smem:[#allocation16_spill]] }
  0x32   :  { %v117_v2 = vunpack.c.l.s4 %v3702_v1  ;;  %vm108_vm2 = vmor %vm107_vm1, %vm106_vm0  ;;  %v3703_v5 = vmov 0.0   ;;  %s3704_s27 = smov 109   ;;  %s3705_s28 = smov 31   ;;  %vm140_vm3 = vcmask 252928   ;;  %vm164_vm4 = vcmask 1041256  }
  0x33   :  { %v111_v3 = vand.u32 127, %v110_v0  ;;  %v3876_v4 = vshrl.u32 %v110_v0, 7  ;;  %353 = vmatprep.mubr.f32.mxu0 %v3703_v5  ;;  %275 = vmatprep.mubr.f32.mxu1 %v3703_v5  ;;  %109 = vst.msk [vmem:[#allocation2] sm:$0xff] %vm108_vm2, %v3703_v5  ;;  %s3706_s29 = smov 8   ;;  %s3707_s0 = smov 4   ;;  %vm165_vm5 = vcmask 667652  }
  0x34   :  { %v118_v6 = vunpack.c.0.s8 %v117_v2  ;;  %vm126_vm6 = vcmask 852000   ;;  %vm180_vm7 = vcmask 64512   ;;  %vm166_vm8 = vmor %vm165_vm5, %vm164_vm4  ;;  %vm161_vm9 = vcmask 891904   ;;  %s3708_s7 = smov 126   ;;  %s4542_s26 = sld [smem:[#allocation19_spill]] }
  0x35   :  { %v112_v7 = vcvt.s32.f32 %v111_v3  ;;  %vm206_vm10 = vcmask 1042432   ;;  %vm202_vm11 = vcmask 23552   ;;  %s3709_s19 = smov 125   ;;  %s3710_s3 = smov 127   ;;  %v3711_v35 = vmov 0  }
  0x36   :  { %v121_v8 = vsub.s32 %v118_v6, %v3876_v4  ;;  %3570 = vset.pattern.permute.xlu1 %v3711_v35  ;;  %3569 = vset.pattern.permute.xlu0 %v3711_v35  ;;  %s4543_s1 = sld [smem:[#allocation20_spill]]  ;;  %vm365_vm12 = vcmask 1031168   ;;  %vm452_vm13 = vcmask 1022976   ;;  %vm200_vm14 = vcmask 1039360   ;;  %s4544_s8 = sld [smem:[#allocation18_spill]] }
  0x37   :  { %v113_v9 = vmul.f32 0.01, %v112_v7  ;;  %v128_v10 = vld [vmem:[%s4541_s25] sm:$0x5]  ;;  %v168_v11 = vld [vmem:[%s4541_s25 + $0x1] sm:$0x5] }
  0x38   :  { %v149_v12 = vld [vmem:[%s4541_s25 + $0x1] sm:$0x1]  ;;  %v136_v13 = vrot.slane %v128_v10, %v121_v8  ;;  %v176_v14 = vrot.slane %v168_v11, %v121_v8  ;;  %v114_v16 = vld [vmem:[%s4541_s25] sm:$0x1]  ;;  %s3712_s25 = smov 124   ;;  %vm539_vm15 = vcmask 1014784  }
  0x39   :  { %184 = vrot.lane.b32.xlu1 %v113_v9, %s3704_s27  ;;  %v157_v15 = vrot.slane %v149_v12, %v121_v8  ;;  %v122_v17 = vrot.slane %v114_v16, %v121_v8  ;;  %v3948_v62 = vsub.s32 0, %v3876_v4  ;;  %v3951_v63 = vsub.s32 1, %v3876_v4  ;;  %s3713_s4 = smov 2   ;;  %s4548_s6 = sld [smem:[#allocation21_spill]] }
  0x3a   :  { %137 = vrot.lane.b32.xlu0 %v136_v13, %s3705_s28  ;;  %v192_v34 = vld [vmem:[%s4542_s26] sm:$0xf]  ;;  %v360_v39 = vld [vmem:[%s4542_s26 + $0x8] sm:$0xf]  ;;  %v447_v46 = vld [vmem:[%s4542_s26 + $0xc] sm:$0xf] }
  0x3b   :  { %v193_v47 = vld [vmem:[%s4542_s26 + $0x4] sm:$0xf]  ;;  %v534_v52 = vld [vmem:[%s4542_s26 + $0x10] sm:$0xf]  ;;  %vm653_vm1 = vcmask 1043472   ;;  %vm654_vm2 = vcmask 687108  }
  0x3c   :  { %v621_v36 = vld [vmem:[%s4543_s1] sm:$0xf]  ;;  %vm3965_vm4 = vmor %vm654_vm2, %vm653_vm1  ;;  %vm667_vm5 = vcmask 31744   ;;  %s4549_s5 = sld [smem:[#allocation23_spill]]  ;;  %s3717_s1 = smov 120   ;;  %vm1170_vm2 = vcmask 1040760  }
  0x3d   :  { %177 = vrot.lane.b32.xlu1 %v176_v14, %s3706_s29  ;;  %v190_v0 = vld [vmem:[%s4544_s8] sm:$0x3]  ;;  %s3720_s2 = smov 43   ;;  %s3721_s26 = smov 66  }
  0x3e   :  { %158 = vrot.lane.b32.xlu0 %v157_v15, %s3704_s27  ;;  %v3957_v1 = vrot.slane %v190_v0, %v3948_v62  ;;  %v3960_v2 = vrot.slane %v190_v0, %v3951_v63  ;;  %s4547_s27 = sld [smem:[#allocation22_spill]] }
  0x41   :  { %145 = vrot.lane.b32.xlu1 %v113_v9, %s3707_s0 }
  0x42   :  { %123 = vrot.lane.b32.xlu0 %v122_v17, %s3707_s0  ;;  %v1258_v0 = vld [vmem:[%s4549_s5 + $0x98] sm:$0xff]  ;;  %s3716_s0 = smov 97  }
  0x44   :  { %v1082_v16 = vld [vmem:[%s4547_s27] sm:$0xf] }
  0xab   :  { %v185_v18 = vpop.permute.xlu1 %184 }
  0xac   :  { %v138_v19 = vpop.permute.xlu0 %137  ;;  %v186_v22 = vrot.slane %v185_v18, 4 }
  0xad   :  { %v139_v20 = vrot.slane %v138_v19, 4 }
  0xae   :  { %v187_v29 = vsel %vm161_vm9, %v186_v22, %v185_v18  ;;  %v658_v22 = vld [vmem:[%s4548_s6] sm:$0xf] }
  0xaf   :  { %v178_v21 = vpop.permute.xlu1 %177  ;;  %v141_v23 = vsel %vm140_vm3, %v138_v19, %v139_v20  ;;  %vm650_vm3 = vcmask 15360   ;;  %v659_v19 = vld [vmem:[%s4548_s6 + $0x4] sm:$0xf] }
  0xb0   :  { %v179_v24 = vrot.slane %v178_v21, 4  ;;  %143 = vst.msk [vmem:[#allocation2 + $0x1] sm:$0x1] %vm126_vm6, %v141_v23  ;;  %v159_v25 = vpop.permute.xlu0 %158 }
  0xb1   :  { %v160_v27 = vrot.slane %v159_v25, 4 }
  0xb2   :  { %v181_v26 = vsel %vm180_vm7, %v179_v24, %v178_v21  ;;  %vm1115_vm7 = vcmask 819200  }
  0xb3   :  { %183 = vst.msk [vmem:[#allocation2 + $0x1] sm:$0x11] %vm166_vm8, %v181_v26  ;;  %v146_v28 = vpop.permute.xlu1 %145  ;;  %v162_v31 = vsel %vm161_vm9, %v160_v27, %v159_v25  ;;  %v824_v26 = vld [vmem:[%s4548_s6 + $0x8] sm:$0xf]  ;;  %vm1133_vm9 = vcmask 600066  }
  0xb4   :  { %148 = vst.msk [vmem:[#allocation2 + $0x2] sm:$0x1] %vm126_vm6, %v146_v28  ;;  %v124_v30 = vpop.permute.xlu0 %123 }
  0xb5   :  { %189 = vst.msk [vmem:[#allocation2 + $0x2] sm:$0x11] %vm166_vm8, %v187_v29 }
  0xb6   :  { %127 = vst.msk [vmem:[#allocation2] sm:$0x1] %vm126_vm6, %v124_v30  ;;  %v910_v30 = vld [vmem:[%s4548_s6 + $0xc] sm:$0xf]  ;;  %vm1186_vm6 = vcmask 154624  }
  0xb7   :  { %167 = vst.msk [vmem:[#allocation2] sm:$0x11] %vm166_vm8, %v162_v31  ;;  %vm1132_vm8 = vcmask 1041192  }
  0xbe   :  { %v191_v32 = vld [vmem:[#allocation2] sm:$0x77] }
  0xbf   :  { %361 = vrot.lane.b32.xlu0 %v191_v32, %s3708_s7  ;;  %v195_v33 = vcombine.high %v191_v32, %v191_v32 }
  0xc1   :  { %363 = vrot.lane.b32.xlu1 %v195_v33, %s3708_s7  ;;  %2914 = vmatprep.subr.msk.mxu0 %vm206_vm10, %v195_v33 }
  0xc2   :  { %2915 = vmatpush1.msk.msra.mxu0 %vm206_vm10, %v191_v32 }
  0xc3   :  { %448 = vrot.lane.b32.xlu0 %v191_v32, %s3709_s19  ;;  %2916 = vmatmul.mubr.msk.f32.vlgmr.msra.gmra.mrb[0].mxu0 %vm202_vm11, %v192_v34 }
  0xc4   :  { %438 = vmatprep.mubr.f32.mxu0 %v3703_v5 }
  0xc5   :  { %450 = vrot.lane.b32.xlu1 %v195_v33, %s3709_s19 }
  0xc7   :  { %196 = vrot.lane.b32.xlu0 %v191_v32, %s3710_s3 }
  0xc9   :  { %198 = vrot.lane.b32.xlu1 %v195_v33, %s3710_s3 }
  0xcb   :  { %535 = vrot.lane.b32.xlu0 %v191_v32, %s3712_s25 }
  0xcd   :  { %537 = vrot.lane.b32.xlu1 %v195_v33, %s3712_s25  ;;  %v996_v33 = vld [vmem:[%s4548_s6 + $0x10] sm:$0xf] }
  0xcf   :  { %624 = vperm.xlu0 %3569, %v621_v36  }
 0x131   :  { %v362_v37 = vpop.permute.xlu0 %361 }
 0x133   :  { %v364_v38 = vpop.permute.xlu1 %363 }
 0x134   :  { %v366_v40 = vsel %vm365_vm12, %v362_v37, %v364_v38  ;;  %2917 = vmatprep.subr.msk.mxu0 %vm206_vm10, %v364_v38 }
 0x135   :  { %v449_v41 = vpop.permute.xlu0 %448  ;;  %2918 = vmatpush1.msk.msra.mxu0 %vm206_vm10, %v366_v40 }
 0x136   :  { %2919 = vmatmul.mubr.msk.f32.vlgmr.msra.gmra.mrb[0].mxu0 %vm202_vm11, %v360_v39 }
 0x137   :  { %v451_v42 = vpop.permute.xlu1 %450  ;;  %525 = vmatprep.mubr.f32.mxu0 %v3703_v5 }
 0x138   :  { %v453_v43 = vsel %vm452_vm13, %v449_v41, %v451_v42  ;;  %2920 = vmatprep.subr.msk.mxu0 %vm206_vm10, %v451_v42 }
 0x139   :  { %v197_v44 = vpop.permute.xlu0 %196  ;;  %2921 = vmatpush1.msk.msra.mxu0 %vm206_vm10, %v453_v43 }
 0x13b   :  { %v199_v45 = vpop.permute.xlu1 %198 }
 0x13c   :  { %2911 = vmatprep.subr.msk.mxu1 %vm206_vm10, %v199_v45  ;;  %v201_v48 = vsel %vm200_vm14, %v197_v44, %v199_v45  ;;  %v1271_v44 = vld [vmem:[%s4549_s5 + $0x100] sm:$0xff]  ;;  %v1272_v45 = vld [vmem:[%s4549_s5 + $0x108] sm:$0xff] }
 0x13d   :  { %2912 = vmatpush1.msk.msra.mxu1 %vm206_vm10, %v201_v48  ;;  %v536_v49 = vpop.permute.xlu0 %535  ;;  %v3180_v48 = vpack.c.bf16 %v1272_v45, %v1271_v44  ;;  %v1265_v45 = vld [vmem:[%s4549_s5 + $0xd0] sm:$0xff] }
 0x13e   :  { %2922 = vmatmul.mubr.msk.f32.vlgmr.msra.gmra.mrb[0].mxu0 %vm202_vm11, %v447_v46  ;;  %2913 = vmatmul.mubr.msk.f32.vlgmr.msra.gmra.mrb[0].mxu1 %vm202_vm11, %v193_v47  ;;  %v1255_v46 = vld [vmem:[%s4549_s5 + $0x80] sm:$0xff]  ;;  %v3714_v47 = vmov 0.0|0.0  }
 0x13f   :  { %v538_v50 = vpop.permute.xlu1 %537  ;;  %612 = vmatprep.mubr.f32.mxu0 %v3703_v5  ;;  %739 = vmatprep.mubr.f32.mxu1 %v3703_v5 }
 0x140   :  { %v540_v51 = vsel %vm539_vm15, %v536_v49, %v538_v50  ;;  %2923 = vmatprep.subr.msk.mxu0 %vm206_vm10, %v538_v50  ;;  %v1256_v49 = vld [vmem:[%s4549_s5 + $0x88] sm:$0xff]  ;;  %v1239_v50 = vld [vmem:[%s4549_s5] sm:$0xff] }
 0x141   :  { %2924 = vmatpush1.msk.msra.mxu0 %vm206_vm10, %v540_v51  ;;  %v1240_v51 = vld [vmem:[%s4549_s5 + $0x8] sm:$0xff]  ;;  %vm1202_vm10 = vcmask 982016  }
 0x146   :  { %2925 = vmatmul.mubr.msk.f32.vlgmr.msra.gmra.mrb[0].mxu0 %vm202_vm11, %v534_v52  ;;  %v3147_v52 = vpack.c.bf16 %v1256_v49, %v1255_v46  ;;  %v1266_v46 = vld [vmem:[%s4549_s5 + $0xd8] sm:$0xff]  ;;  %v1249_v49 = vld [vmem:[%s4549_s5 + $0x50] sm:$0xff]  ;;  %vm4201_vm11 = vmor %vm1133_vm9, %vm1132_vm8  ;;  %vm1234_vm8 = vcmask 539648   ;;  %vm3723_vm9 = vmmov 0  }
 0x148   :  { %3148 = vmatprep.subr.bf16.mxu0 %v3147_v52 }
 0x14e   :  { %v625_v56 = vpop.permute.xlu0 %624 }
 0x211   :  { %v277_v53 = vpop.f32.mrb[0].mxu1 }
 0x212   :  { %v279_v54 = vpop.f32.mrb[1].mxu1 }
 0x219   :  { %v614_v55 = vpop.f32.mrb[0].mxu0 }
 0x21a   :  { %v3524_v57 = vadd.f32 %v614_v55, %v277_v53  ;;  %v616_v58 = vpop.f32.mrb[1].mxu0  ;;  %v3149_v53 = vpack.c.bf16 %v1240_v51, %v1239_v50  ;;  %v1274_v55 = vld [vmem:[%s4549_s5 + $0x118] sm:$0xff]  ;;  %v1283_v51 = vld [vmem:[%s4549_s5 + $0x160] sm:$0xff] }
 0x21b   :  { %v3525_v59 = vadd.f32 %v616_v58, %v279_v54  ;;  %v1273_v54 = vld [vmem:[%s4549_s5 + $0x110] sm:$0xff]  ;;  %v1250_v50 = vld [vmem:[%s4549_s5 + $0x58] sm:$0xff] }
 0x21c   :  { %v627_v60 = vadd.f32 %v3524_v57, %v625_v56  ;;  %3150 = vmatpush3.bf16.msra.mxu0 %v3149_v53  ;;  %v3169_v53 = vpack.c.bf16 %v1250_v50, %v1249_v49 }
 0x21d   :  { %v628_v61 = vadd.f32 %v3525_v59, %v625_v56  ;;  %v3183_v56 = vpack.c.bf16 %v1274_v55, %v1273_v54  ;;  %v1284_v54 = vld [vmem:[%s4549_s5 + $0x168] sm:$0xff]  ;;  %v1267_v55 = vld [vmem:[%s4549_s5 + $0xe0] sm:$0xff] }
 0x21e   :  { %3574 = vtanh.f32 %v627_v60 }
 0x21f   :  { %3576 = vtanh.f32 %v628_v61  ;;  %v1257_v61 = vld [vmem:[%s4549_s5 + $0x90] sm:$0xff] }
 0x228   :  { %v3575_v3 = vpop.eup %3574 }
 0x229   :  { %v3577_v6 = vpop.eup %3576  ;;  %v642_v7 = vmul.f32 %v3575_v3, %v3957_v1  ;;  %v3151_v3 = vpack.c.bf16 %v1258_v0, %v1257_v61  ;;  %v1252_v61 = vld [vmem:[%s4549_s5 + $0x68] sm:$0xff]  ;;  %v1285_v0 = vld [vmem:[%s4549_s5 + $0x170] sm:$0xff] }
 0x22a   :  { %v643_v8 = vmul.f32 %v3577_v6, %v3960_v2  ;;  %v1242_v6 = vld [vmem:[%s4549_s5 + $0x18] sm:$0xff] }
 0x22b   :  { %3152 = vmatprep.subr.bf16.mxu0 %v3151_v3  ;;  %v1270_v3 = vld [vmem:[%s4549_s5 + $0xf8] sm:$0xff] }
 0x22c   :  { %v646_v9 = vcombine.low %v642_v7, %v643_v8  ;;  %v1275_v7 = vld [vmem:[%s4549_s5 + $0x120] sm:$0xff]  ;;  %v1276_v8 = vld [vmem:[%s4549_s5 + $0x128] sm:$0xff] }
 0x22e   :  { %647 = vrot.lane.b32.xlu1 %v646_v9, %s3713_s4 }
 0x2a0   :  { %v648_v10 = vpop.permute.xlu1 %647 }
 0x2a1   :  { %v649_v12 = vrot.slane %v648_v10, 4 }
 0x2a3   :  { %v651_v13 = vsel %vm650_vm3, %v649_v12, %v648_v10  ;;  %v3186_v10 = vpack.c.bf16 %v1276_v8, %v1275_v7 }
 0x2a4   :  { %656 = vst.msk [vmem:[#allocation2] sm:$0xff] %vm3965_vm4, %v651_v13  ;;  %v1259_v13 = vld [vmem:[%s4549_s5 + $0xa0] sm:$0xff] }
 0x2ab   :  { %v657_v14 = vld [vmem:[#allocation2] sm:$0xff] }
 0x2ac   :  { %662 = vrot.lane.b32.xlu1 %v657_v14, %s3710_s3  ;;  %v661_v15 = vcombine.high %v657_v14, %v657_v14 }
 0x2ae   :  { %664 = vrot.lane.b32.xlu0 %v661_v15, %s3710_s3  ;;  %s4550_s3 = sld [smem:[#allocation17_spill]] }
 0x2b0   :  { %825 = vrot.lane.b32.xlu1 %v657_v14, %s3708_s7 }
 0x2b2   :  { %827 = vrot.lane.b32.xlu0 %v661_v15, %s3708_s7  ;;  %s3718_s7 = smov 70  }
 0x2b4   :  { %911 = vrot.lane.b32.xlu1 %v657_v14, %s3709_s19  ;;  %v4054_v57 = vld [vmem:[%s4550_s3] sm:$0xff] }
 0x2b5   :  { %v2713_v60 = vmul.f32 -0.16666667, %v4054_v57 }
 0x2b6   :  { %913 = vrot.lane.b32.xlu0 %v661_v15, %s3709_s19 }
 0x2b7   :  { %v2714_v12 = vmul.f32 1.442695, %v2713_v60  ;;  %v1251_v60 = vld [vmem:[%s4549_s5 + $0x60] sm:$0xff] }
 0x2b8   :  { %997 = vrot.lane.b32.xlu1 %v657_v14, %s3712_s25  ;;  %v3173_v8 = vpack.c.bf16 %v1252_v61, %v1251_v60 }
 0x2ba   :  { %999 = vrot.lane.b32.xlu0 %v661_v15, %s3712_s25 }
 0x2bc   :  { %1085 = vperm.xlu1 %3570, %v1082_v16   ;;  %v1244_v16 = vld [vmem:[%s4549_s5 + $0x28] sm:$0xff] }
 0x31e   :  { %v663_v17 = vpop.permute.xlu1 %662 }
 0x320   :  { %v665_v18 = vpop.permute.xlu0 %664 }
 0x321   :  { %v666_v20 = vsel %vm200_vm14, %v663_v17, %v665_v18  ;;  %2926 = vmatprep.subr.msk.mxu1 %vm106_vm0, %v665_v18  ;;  %v1277_v17 = vld [vmem:[%s4549_s5 + $0x130] sm:$0xff]  ;;  %v1278_v18 = vld [vmem:[%s4549_s5 + $0x138] sm:$0xff]  ;;  %vm1148_vm14 = vcmask 572416  }
 0x322   :  { %2927 = vmatpush1.msk.msra.mxu1 %vm106_vm0, %v666_v20  ;;  %v826_v23 = vpop.permute.xlu1 %825  ;;  %v3189_v20 = vpack.c.bf16 %v1278_v18, %v1277_v17  ;;  %v1289_v18 = vld [vmem:[%s4549_s5 + $0x190] sm:$0xf] }
 0x323   :  { %2928 = vmatmul.mubr.msk.f32.vlgmr.msra.gmra.mrb[2].mxu1 %vm667_vm5, %v659_v19  ;;  %2929 = vmatprep.subr.msk.mxu1 %vm106_vm0, %v661_v15  ;;  %v1243_v15 = vld [vmem:[%s4549_s5 + $0x20] sm:$0xff] }
 0x324   :  { %2930 = vmatpush1.msk.msra.mxu1 %vm106_vm0, %v657_v14  ;;  %v828_v21 = vpop.permute.xlu0 %827  ;;  %817 = vmatprep.mubr.f32.mxu1 %v3703_v5  ;;  %v1260_v14 = vld [vmem:[%s4549_s5 + $0xa8] sm:$0xff]  ;;  %v3157_v19 = vpack.c.bf16 %v1244_v16, %v1243_v15  ;;  %v1287_v15 = vld [vmem:[%s4549_s5 + $0x180] sm:$0xff] }
 0x325   :  { %2932 = vmatprep.subr.msk.mxu1 %vm106_vm0, %v828_v21  ;;  %v829_v24 = vsel %vm365_vm12, %v826_v23, %v828_v21  ;;  %v3155_v11 = vpack.c.bf16 %v1260_v14, %v1259_v13  ;;  %v1261_v21 = vld [vmem:[%s4549_s5 + $0xb0] sm:$0xff]  ;;  %v1254_v13 = vld [vmem:[%s4549_s5 + $0x78] sm:$0xff]  ;;  %vm1152_vm12 = vcmask 378882  }
 0x326   :  { %v912_v27 = vpop.permute.xlu1 %911  ;;  %v1245_v23 = vld [vmem:[%s4549_s5 + $0x30] sm:$0xff] }
 0x328   :  { %v914_v25 = vpop.permute.xlu0 %913 }
 0x329   :  { %v915_v28 = vsel %vm452_vm13, %v912_v27, %v914_v25  ;;  %v1279_v27 = vld [vmem:[%s4549_s5 + $0x140] sm:$0xff]  ;;  %vm1129_vm13 = vcmask 793600  }
 0x32a   :  { %v998_v31 = vpop.permute.xlu1 %997 }
 0x32b   :  { %2931 = vmatmul.mubr.msk.f32.vlgmr.msra.gmra.mrb[2].mxu1 %vm667_vm5, %v658_v22  ;;  %v1262_v22 = vld [vmem:[%s4549_s5 + $0xb8] sm:$0xff] }
 0x32c   :  { %2933 = vmatpush1.msk.msra.mxu1 %vm106_vm0, %v829_v24  ;;  %901 = vmatprep.mubr.f32.mxu1 %v3703_v5  ;;  %v1000_v29 = vpop.permute.xlu0 %999 }
 0x32d   :  { %2935 = vmatprep.subr.msk.mxu1 %vm106_vm0, %v914_v25  ;;  %v1001_v32 = vsel %vm539_vm15, %v998_v31, %v1000_v29  ;;  %v3159_v25 = vpack.c.bf16 %v1262_v22, %v1261_v21  ;;  %vm1218_vm15 = vcmask 760832  }
 0x333   :  { %2934 = vmatmul.mubr.msk.f32.vlgmr.msra.gmra.mrb[2].mxu1 %vm667_vm5, %v824_v26  ;;  %v1246_v26 = vld [vmem:[%s4549_s5 + $0x38] sm:$0xff] }
 0x334   :  { %2936 = vmatpush1.msk.msra.mxu1 %vm106_vm0, %v915_v28  ;;  %987 = vmatprep.mubr.f32.mxu1 %v3703_v5 }
 0x335   :  { %2938 = vmatprep.subr.msk.mxu1 %vm106_vm0, %v1000_v29  ;;  %v3161_v29 = vpack.c.bf16 %v1246_v26, %v1245_v23 }
 0x33b   :  { %2937 = vmatmul.mubr.msk.f32.vlgmr.msra.gmra.mrb[2].mxu1 %vm667_vm5, %v910_v30  ;;  %v1086_v34 = vpop.permute.xlu1 %1085  ;;  %v1280_v30 = vld [vmem:[%s4549_s5 + $0x148] sm:$0xff] }
 0x33c   :  { %2939 = vmatpush1.msk.msra.mxu1 %vm106_vm0, %v1001_v32  ;;  %1073 = vmatprep.mubr.f32.mxu1 %v3703_v5  ;;  %v3192_v31 = vpack.c.bf16 %v1280_v30, %v1279_v27 }
 0x33d   :  { %3179 = vmatprep.subr.bf16.mxu1 %v3714_v47 }
 0x343   :  { %2940 = vmatmul.mubr.msk.f32.vlgmr.msra.gmra.mrb[2].mxu1 %vm667_vm5, %v996_v33  ;;  %v1263_v33 = vld [vmem:[%s4549_s5 + $0xc0] sm:$0xff]  ;;  %vm1167_vm5 = vcmask 351232  }
 0x344   :  { %3181 = vmatpush1.bf16.msra.mxu1 %v3180_v48  ;;  %v3167_v48 = vpack.c.bf16 %v1266_v46, %v1265_v45 }
 0x345   :  { %3182 = vmatprep.subr.bf16.mxu1 %v3714_v47 }
 0x348   :  { %3184 = vmatpush1.bf16.msra.mxu1 %v3183_v56  ;;  %v1268_v56 = vld [vmem:[%s4549_s5 + $0xe8] sm:$0xff] }
 0x349   :  { %3185 = vmatprep.subr.bf16.mxu1 %v3714_v47 }
 0x34c   :  { %3187 = vmatpush1.bf16.msra.mxu1 %v3186_v10 }
 0x34d   :  { %3188 = vmatprep.subr.bf16.mxu1 %v3714_v47 }
 0x350   :  { %3190 = vmatpush1.bf16.msra.mxu1 %v3189_v20 }
 0x351   :  { %3191 = vmatprep.subr.bf16.mxu1 %v3714_v47 }
 0x354   :  { %3193 = vmatpush1.bf16.msra.mxu1 %v3192_v31 }
 0x355   :  { %3194 = vmatprep.subr.bf16.mxu1 %v3714_v47 }
 0x416   :  { %v1075_v35 = vpop.f32.mrb[2].mxu1 }
 0x417   :  { %v1088_v36 = vadd.f32 %v1086_v34, %v1075_v35  ;;  %v1077_v37 = vpop.f32.mrb[3].mxu1 }
 0x418   :  { %v1089_v38 = vadd.f32 %v1086_v34, %v1077_v37  ;;  %v1264_v34 = vld [vmem:[%s4549_s5 + $0xc8] sm:$0xff]  ;;  %v1247_v37 = vld [vmem:[%s4549_s5 + $0x40] sm:$0xff] }
 0x419   :  { %3578 = vtanh.f32 %v1088_v36  ;;  %v3163_v36 = vpack.c.bf16 %v1264_v34, %v1263_v33 }
 0x41a   :  { %3580 = vtanh.f32 %v1089_v38  ;;  %v1248_v38 = vld [vmem:[%s4549_s5 + $0x48] sm:$0xff] }
 0x41b   :  { %3582 = vpow2.f32 %v2714_v12  ;;  %v1253_v12 = vld [vmem:[%s4549_s5 + $0x70] sm:$0xff] }
 0x41c   :  { %v3177_v16 = vpack.c.bf16 %v1254_v13, %v1253_v12  ;;  %v1554_v13 = vld [vmem:[%s4514_s11 + $0x18] sm:$0xff] }
 0x423   :  { %v3579_v39 = vpop.eup %3578 }
 0x424   :  { %v3581_v40 = vpop.eup %3580  ;;  %v1092_v41 = vmul.f32 %v3579_v39, %v3957_v1  ;;  %v1241_v1 = vld [vmem:[%s4549_s5 + $0x10] sm:$0xff] }
 0x425   :  { %v1093_v42 = vmul.f32 %v3581_v40, %v3960_v2  ;;  %v3153_v9 = vpack.c.bf16 %v1242_v6, %v1241_v1  ;;  %v3165_v40 = vpack.c.bf16 %v1248_v38, %v1247_v37  ;;  %v3583_v52 = vpop.eup %3582  ;;  %v1286_v1 = vld [vmem:[%s4549_s5 + $0x178] sm:$0xff] }
 0x426   :  { %v2716_v7 = vsub.f32 1.0, %v3583_v52  ;;  %v3201_v10 = vpack.c.bf16 %v1286_v1, %v1285_v0 }
 0x427   :  { %v1096_v43 = vcombine.low %v1092_v41, %v1093_v42  ;;  %3154 = vmatpush3.bf16.msra.mxu0 %v3153_v9  ;;  %v1281_v41 = vld [vmem:[%s4549_s5 + $0x150] sm:$0xff]  ;;  %v1282_v42 = vld [vmem:[%s4549_s5 + $0x158] sm:$0xff] }
 0x428   :  { %3156 = vmatprep.subr.bf16.mxu0 %v3155_v11  ;;  %v3195_v44 = vpack.c.bf16 %v1282_v42, %v1281_v41  ;;  %v1288_v11 = vld [vmem:[%s4549_s5 + $0x188] sm:$0xff] }
 0x429   :  { %1097 = vrot.lane.b32.xlu0 %v1096_v43, %s3713_s4  ;;  %s3715_s4 = smov 19   ;;  %v3204_v17 = vpack.c.bf16 %v1288_v11, %v1287_v15  ;;  %v2956_v15 = vld [vmem:[%s4512_s9 + $0x20] sm:$0xff]  ;;  %v2957_v11 = vld [vmem:[%s4512_s9 + $0x28] sm:$0xff] }
 0x42a   :  { %3196 = vmatpush1.bf16.msra.mxu1 %v3195_v44 }
 0x42b   :  { %3158 = vmatpush3.bf16.msra.mxu0 %v3157_v19  ;;  %3197 = vmatprep.subr.bf16.mxu1 %v3714_v47 }
 0x42c   :  { %3160 = vmatprep.subr.bf16.mxu0 %v3159_v25 }
 0x42f   :  { %3162 = vmatpush3.bf16.msra.mxu0 %v3161_v29 }
 0x430   :  { %3164 = vmatprep.subr.bf16.mxu0 %v3163_v36 }
 0x433   :  { %3166 = vmatpush3.bf16.msra.mxu0 %v3165_v40 }
 0x434   :  { %3168 = vmatprep.subr.bf16.mxu0 %v3167_v48 }
 0x437   :  { %3170 = vmatpush3.bf16.msra.mxu0 %v3169_v53  ;;  %v1465_v53 = vld [vmem:[%s4512_s9] sm:$0xff] }
 0x49b   :  { %v1098_v58 = vpop.permute.xlu0 %1097 }
 0x49c   :  { %v1099_v59 = vrot.slane %v1098_v58, 4 }
 0x49e   :  { %v1100_v2 = vsel %vm650_vm3, %v1099_v59, %v1098_v58  ;;  %v3198_v58 = vpack.c.bf16 %v1284_v54, %v1283_v51  ;;  %v3171_v59 = vpack.c.bf16 %v1268_v56, %v1267_v55  ;;  %v1466_v54 = vld [vmem:[%s4512_s9 + $0x8] sm:$0xff]  ;;  %v1468_v56 = vld [vmem:[%s4512_s9 + $0x18] sm:$0xff] }
 0x49f   :  { %1102 = vst.msk [vmem:[#allocation2] sm:$0xff] %vm3965_vm4, %v1100_v2  ;;  %v1269_v2 = vld [vmem:[%s4549_s5 + $0xf0] sm:$0xff]  ;;  %vm1171_vm4 = vcmask 157698   ;;  %v3207_v55 = vpack.c.bf16 %v1466_v54, %v1465_v53  ;;  %v2002_v53 = vld [vmem:[#allocation4 + $0x10] sm:$0xff] }
 0x4a0   :  { %3199 = vmatpush1.bf16.msra.mxu1 %v3198_v58  ;;  %3172 = vmatprep.subr.bf16.mxu0 %v3171_v59  ;;  %v3175_v14 = vpack.c.bf16 %v1270_v3, %v1269_v2 }
 0x4a1   :  { %3200 = vmatprep.subr.bf16.mxu1 %v3714_v47  ;;  %3174 = vmatpush3.bf16.msra.mxu0 %v3173_v8  ;;  %v1551_v8 = vld [vmem:[%s4514_s11] sm:$0xff] }
 0x4a2   :  { %3176 = vmatprep.subr.bf16.mxu0 %v3175_v14 }
 0x4a4   :  { %3202 = vmatpush1.bf16.msra.mxu1 %v3201_v10  ;;  %v1553_v10 = vld [vmem:[%s4514_s11 + $0x10] sm:$0xff] }
 0x4a5   :  { %3203 = vmatprep.subr.bf16.mxu1 %v3714_v47  ;;  %3178 = vmatpush3.bf16.msra.mxu0 %v3177_v16  ;;  %v3216_v14 = vpack.c.bf16 %v1554_v13, %v1553_v10  ;;  %v3219_v16 = vpack.c.bf16 %v2957_v11, %v2956_v15  ;;  %v2010_v15 = vld [vmem:[#allocation4 + $0x50] sm:$0xff]  ;;  %v2013_v11 = vld [vmem:[#allocation4 + $0x68] sm:$0xff] }
 0x4a6   :  { %v2945_v24 = vld.sshfl [vmem:[#allocation2] sm:$0x5 pattern:$0x76325410]  ;;  %3218 = vmatprep.subr.bf16.mxu0 %v3714_v47 }
 0x4a7   :  { %1183 = vrot.lane.b32.xlu1 %v2945_v24, %s3715_s4  ;;  %v2942_v28 = vld.sshfl [vmem:[#allocation2 + $0x1] sm:$0x1 pattern:$0x76325410] }
 0x4a8   :  { %1126 = vrot.lane.b32.xlu0 %v2942_v28, %s3716_s0  ;;  %v2946_v32 = vld.sshfl [vmem:[#allocation2 + $0x1] sm:$0x5 pattern:$0x76325410]  ;;  %3205 = vmatpush1.bf16.msra.mxu1 %v3204_v17  ;;  %v2952_v17 = vld [vmem:[%s4513_s10] ss:$0 sm:$0xff] }
 0x4a9   :  { %v2943_v35 = vld.sshfl [vmem:[#allocation2 + $0x2] sm:$0x1 pattern:$0x76325410]  ;;  %1430 = vmatprep.subr.mxu1 %v3703_v5 }
 0x4aa   :  { %v2947_v39 = vld.sshfl [vmem:[#allocation2 + $0x2] sm:$0x5 pattern:$0x76325410] }
 0x4ab   :  { %1199 = vrot.lane.b32.xlu1 %v2946_v32, %s3717_s1  ;;  %v2941_v43 = vld.sshfl [vmem:[#allocation2] sm:$0x1 pattern:$0x76325410] }
 0x4ac   :  { %1145 = vrot.lane.b32.xlu0 %v2943_v35, %s3718_s7  ;;  %s3719_s7 = smov 93   ;;  %v2944_v6 = vld.sshfl [vmem:[#allocation2 + $0x3] sm:$0x1 pattern:$0x76325410]  ;;  %2950 = vmatpush1.msk.msra.mxu1 %vm106_vm0, %v1289_v18  ;;  %vm1151_vm0 = vcmask 1040976  }
 0x4ad   :  { %v2948_v9 = vld.sshfl [vmem:[#allocation2 + $0x3] sm:$0x5 pattern:$0x76325410]  ;;  %3206 = vmatprep.subr.bf16.mxu1 %v3714_v47  ;;  %vm1153_vm1 = vmor %vm1152_vm12, %vm1151_vm0  ;;  %vm2878_vm0 = vcmask 58368  }
 0x4af   :  { %1215 = vrot.lane.b32.xlu1 %v2947_v39, %s3719_s7  ;;  %v3722_v39 = vmov 1983009808  }
 0x4b0   :  { %1112 = vrot.lane.b32.xlu0 %v2941_v43, %s3712_s25  ;;  %v1300_v40 = vunpack.c.l.s4 %v3722_v39  ;;  %v1813_v39 = vld [vmem:[%s4516_s13 + $0x8] sm:$0xff] }
 0x4b2   :  { %v1301_v44 = vunpack.c.0.s8 %v1300_v40 }
 0x4b3   :  { %1164 = vrot.lane.b32.xlu1 %v2944_v6, %s3720_s2 }
 0x4b4   :  { %1231 = vrot.lane.b32.xlu0 %v2948_v9, %s3721_s26  ;;  %v1304_v45 = vsub.s32 %v1301_v44, %v3876_v4  ;;  %v1467_v4 = vld [vmem:[%s4512_s9 + $0x10] sm:$0xff]  ;;  %s4553_s26 = sld [smem:[#allocation24_spill]]  ;;  %v1552_v9 = vld [vmem:[%s4514_s11 + $0x8] sm:$0xff] }
 0x4b5   :  { %v3210_v58 = vpack.c.bf16 %v1468_v56, %v1467_v4  ;;  %v3213_v12 = vpack.c.bf16 %v1552_v9, %v1551_v8  ;;  %v2969_v4 = vld [vmem:[%s4515_s12 + $0x1] ss:$0 sm:$0xff]  ;;  %v2007_v56 = vld [vmem:[#allocation4 + $0x38] sm:$0xff] }
 0x4b7   :  { %2719 = vperm.xlu1 %3570, %v2716_v7  }
 0x4ba   :  { %v2949_v61 = vld [vmem:[%s4553_s26] ss:$0 sm:$0xff] }
 0x519   :  { %v1184_v19 = vpop.permute.xlu1 %1183 }
 0x51a   :  { %v1185_v20 = vrot.slane %v1184_v19, 2  ;;  %v1127_v21 = vpop.permute.xlu0 %1126 }
 0x51b   :  { %v1128_v27 = vrot.slane %v1127_v21, 6 }
 0x51c   :  { %v1187_v22 = vsel %vm1186_vm6, %v1184_v19, %v1185_v20  ;;  %vm1172_vm6 = vmor %vm1171_vm4, %vm1170_vm2 }
 0x51d   :  { %1189 = vst.msk [vmem:[#allocation3 + $0x1] sm:$0x1] %vm1115_vm7, %v1187_v22  ;;  %v1200_v23 = vpop.permute.xlu1 %1199  ;;  %v1130_v33 = vsel %vm1129_vm13, %v1128_v27, %v1127_v21  ;;  %v2958_v22 = vld [vmem:[%s4512_s9 + $0x30] sm:$0xff] }
 0x51e   :  { %v1201_v25 = vrot.slane %v1200_v23, 2  ;;  %v1146_v26 = vpop.permute.xlu0 %1145 }
 0x51f   :  { %v1147_v29 = vrot.slane %v1146_v26, 6 }
 0x520   :  { %v1203_v28 = vsel %vm1202_vm10, %v1200_v23, %v1201_v25  ;;  %vm1476_vm10 = vcmask 261120   ;;  %v2959_v23 = vld [vmem:[%s4512_s9 + $0x38] sm:$0xff] }
 0x521   :  { %1205 = vst.msk [vmem:[#allocation3 + $0x1] sm:$0x5] %vm4201_vm11, %v1203_v28  ;;  %v1216_v30 = vpop.permute.xlu1 %1215  ;;  %v1149_v34 = vsel %vm1148_vm14, %v1147_v29, %v1146_v26  ;;  %v3222_v24 = vpack.c.bf16 %v2959_v23, %v2958_v22  ;;  %v2955_v26 = vld [vmem:[%s4515_s12] ss:$0 sm:$0xff]  ;;  %v2019_v22 = vld [vmem:[#allocation4 + $0x98] sm:$0xff] }
 0x522   :  { %v1217_v31 = vrot.slane %v1216_v30, 2  ;;  %v1113_v32 = vpop.permute.xlu0 %1112 }
 0x523   :  { %1116 = vst.msk [vmem:[#allocation3] sm:$0x1] %vm1115_vm7, %v1113_v32  ;;  %vm1318_vm7 = vcmask 162816   ;;  %v2965_v32 = vld [vmem:[%s4514_s11 + $0x30] sm:$0xff] }
 0x524   :  { %v1219_v35 = vsel %vm1218_vm15, %v1216_v30, %v1217_v31  ;;  %1135 = vst.msk [vmem:[#allocation3] sm:$0x5] %vm4201_vm11, %v1130_v33  ;;  %v2963_v30 = vld [vmem:[%s4514_s11 + $0x20] sm:$0xff]  ;;  %v2964_v31 = vld [vmem:[%s4514_s11 + $0x28] sm:$0xff]  ;;  %vm1922_vm11 = vcmask 1041408  }
 0x525   :  { %1221 = vst.msk [vmem:[#allocation3 + $0x3] sm:$0x5] %vm1153_vm1, %v1219_v35  ;;  %1154 = vst.msk [vmem:[#allocation3 + $0x2] sm:$0x5] %vm1153_vm1, %v1149_v34  ;;  %v1165_v36 = vpop.permute.xlu1 %1164  ;;  %v3225_v33 = vpack.c.bf16 %v2964_v31, %v2963_v30  ;;  %v2966_v34 = vld [vmem:[%s4514_s11 + $0x38] sm:$0xff] }
 0x526   :  { %v1166_v37 = vrot.slane %v1165_v36, 6  ;;  %v1232_v38 = vpop.permute.xlu0 %1231  ;;  %v3228_v35 = vpack.c.bf16 %v2966_v34, %v2965_v32  ;;  %v2020_v32 = vld [vmem:[#allocation4 + $0xa0] sm:$0xff]  ;;  %v2025_v34 = vld [vmem:[#allocation4 + $0xc8] sm:$0xff] }
 0x527   :  { %v1233_v41 = vrot.slane %v1232_v38, 2 }
 0x528   :  { %v1168_v42 = vsel %vm1167_vm5, %v1166_v37, %v1165_v36  ;;  %v2972_v36 = vld.sshfl [vmem:[%s4518_s15] sm:$0x33 pattern:$0x76325410] }
 0x529   :  { %1173 = vst.msk [vmem:[#allocation3 + $0x4] sm:$0x5] %vm1172_vm6, %v1168_v42  ;;  %v1235_v43 = vsel %vm1234_vm8, %v1232_v38, %v1233_v41  ;;  %v1918_v37 = vcombine.high %v2972_v36, %v2972_v36  ;;  %v1812_v38 = vld [vmem:[%s4516_s13] sm:$0xff] }
 0x52a   :  { %1237 = vst.msk [vmem:[#allocation3 + $0x5] sm:$0x5] %vm1172_vm6, %v1235_v43  ;;  %v3231_v40 = vpack.c.bf16 %v1813_v39, %v1812_v38  ;;  %v2961_v41 = vld [vmem:[%s4513_s10 + $0x1] ss:$0 sm:$0xff]  ;;  %v2024_v38 = vld [vmem:[#allocation4 + $0xc0] sm:$0xff] }
 0x52b   :  { %v2026_v39 = vld [vmem:[#allocation4 + $0xd0] sm:$0xff] }
 0x531   :  { %v1238_v46 = vld [vmem:[#allocation3] sm:$0xff] }
 0x532   :  { %v1298_v48 = vcombine.high %v1238_v46, %v1238_v46  ;;  %v1305_v49 = vrot.slane %v1238_v46, %v1304_v45  ;;  %v1815_v46 = vld [vmem:[%s4516_s13 + $0x18] sm:$0xff] }
 0x534   :  { %v1313_v50 = vcombine.high %v1305_v49, %v1305_v49  ;;  %v1312_v51 = vrot.slane %v1298_v48, %v1304_v45  ;;  %v2001_v48 = vld [vmem:[#allocation4 + $0x8] sm:$0xff] }
 0x536   :  { %1388 = vmatprep.mubr.f32.mxu0 %v1313_v50  ;;  %v1314_v52 = vcombine.high %v1312_v51, %v1312_v51  ;;  %v2003_v50 = vld [vmem:[#allocation4 + $0x18] sm:$0xff] }
 0x537   :  { %1389 = vmatmul.mubr.f32.vlgmr.msra.gmra.mrb[2].mxu0 %v1305_v49 }
 0x538   :  { %2951 = vmatprep.mubr.msk.f32.mxu1 %vm1318_vm7, %v1314_v52  ;;  %3112 = vmatprep.mubr.msk.f32.mxu0 %vm3723_vm9, %v3703_v5  ;;  %v2000_v52 = vld [vmem:[#allocation4] sm:$0xff] }
 0x539   :  { %1459 = vmatmul.mubr.f32.vlgmr.msra.gmra.mrb[4].mxu1 %v1312_v51  ;;  %3220 = vmatpush3.bf16.msra.mxu0 %v3219_v16  ;;  %v3236_v51 = vpack.c.bf16 %v2003_v50, %v2001_v48  ;;  %v2015_v16 = vld [vmem:[#allocation4 + $0x78] sm:$0xff]  ;;  %v2032_v50 = vld [vmem:[#allocation4 + $0x100] sm:$0xff] }
 0x53a   :  { %3090 = vmatprep.mubr.msk.f32.mxu1 %vm3723_vm9, %v3703_v5  ;;  %3208 = vmatpush3.bf16.msra.mxu1 %v3207_v55  ;;  %v2005_v55 = vld [vmem:[#allocation4 + $0x28] sm:$0xff] }
 0x53b   :  { %3209 = vmatprep.subr.bf16.mxu1 %v3714_v47  ;;  %3221 = vmatprep.subr.bf16.mxu0 %v3714_v47 }
 0x53d   :  { %3223 = vmatpush3.bf16.msra.mxu0 %v3222_v24 }
 0x53e   :  { %3211 = vmatpush3.bf16.msra.mxu1 %v3210_v58  ;;  %3230 = vmatprep.subr.bf16.mxu0 %v3714_v47 }
 0x53f   :  { %3212 = vmatprep.subr.bf16.mxu1 %v3714_v47 }
 0x60a   :  { %v3015_v59 = vpop.f32.mrb[2].mxu0 }
 0x60b   :  { %v3016_v60 = vpop.f32.mrb[3].mxu0 }
 0x60c   :  { %v3017_v0 = vadd.f32 %v3016_v60, %v3015_v59  ;;  %v1460_v1 = vpop.f32.mrb[4].mxu1  ;;  %v3238_v60 = vpack.c.bf16 %v2002_v53, %v2000_v52  ;;  %v2037_v52 = vld [vmem:[#allocation4 + $0x128] sm:$0xff]  ;;  %v2039_v53 = vld [vmem:[#allocation4 + $0x138] sm:$0xff] }
 0x60d   :  { %v1462_v2 = vpop.f32.mrb[5].mxu1 }
 0x60e   :  { %v1391_v3 = vadd.f32 %v3017_v0, %v2949_v61  ;;  %v2004_v2 = vld [vmem:[#allocation4 + $0x20] sm:$0xff] }
 0x610   :  { %v1461_v6 = vadd.f32 %v1460_v1, %v1391_v3  ;;  %v3240_v1 = vpack.c.bf16 %v2007_v56, %v2005_v55  ;;  %v2006_v3 = vld [vmem:[#allocation4 + $0x30] sm:$0xff]  ;;  %v2036_v55 = vld [vmem:[#allocation4 + $0x120] sm:$0xff] }
 0x611   :  { %v3242_v10 = vpack.c.bf16 %v2006_v3, %v2004_v2  ;;  %v2038_v56 = vld [vmem:[#allocation4 + $0x130] sm:$0xff]  ;;  %v2045_v2 = vld [vmem:[#allocation4 + $0x168] sm:$0xff]  ;;  %v2047_v3 = vld [vmem:[#allocation4 + $0x178] sm:$0xff] }
 0x612   :  { %3584 = vtanh.f32 %v1461_v6  ;;  %v2009_v6 = vld [vmem:[#allocation4 + $0x48] sm:$0xff] }
 0x61c   :  { %v3585_v7 = vpop.eup %3584 }
 0x61d   :  { %3091 = vmatmul.mubr.msk.f32.vlgmr.msra.gmra.mrb[6].mxu1 %vm1476_vm10, %v3585_v7 }
 0x61e   :  { %3101 = vmatprep.mubr.msk.f32.mxu1 %vm3723_vm9, %v3703_v5  ;;  %3214 = vmatpush3.bf16.msra.mxu1 %v3213_v12 }
 0x61f   :  { %3215 = vmatprep.subr.bf16.mxu1 %v3714_v47 }
 0x622   :  { %3217 = vmatpush3.bf16.msra.mxu1 %v3216_v14  ;;  %v2008_v14 = vld [vmem:[#allocation4 + $0x40] sm:$0xff] }
 0x623   :  { %3224 = vmatprep.subr.bf16.mxu1 %v3714_v47 }
 0x6f0   :  { %v1546_v18 = vpop.f32.mrb[6].mxu1 }
 0x6f1   :  { %v1547_v19 = vadd.f32 %v2952_v17, %v1546_v18  ;;  %v3092_v20 = vpop.f32.mrb[7].mxu1  ;;  %v3246_v17 = vpack.c.bf16 %v2010_v15, %v2008_v14  ;;  %v3248_v18 = vpack.c.bf16 %v2015_v16, %v2013_v11  ;;  %v2048_v11 = vld [vmem:[#allocation4 + $0x180] sm:$0xff]  ;;  %v2050_v16 = vld [vmem:[#allocation4 + $0x190] sm:$0xff] }
 0x6f2   :  { %v2014_v20 = vld [vmem:[#allocation4 + $0x70] sm:$0xff] }
 0x6f3   :  { %3586 = vtanh.f32 %v1547_v19  ;;  %v2012_v19 = vld [vmem:[#allocation4 + $0x60] sm:$0xff] }
 0x6f4   :  { %v3250_v23 = vpack.c.bf16 %v2014_v20, %v2012_v19  ;;  %v3286_v20 = vpack.c.bf16 %v2050_v16, %v2048_v11  ;;  %v2176_v11 = vld [vmem:[#allocation7 + $0xd8] sm:$0xff] }
 0x6fd   :  { %v3587_v21 = vpop.eup %3586 }
 0x6fe   :  { %3102 = vmatmul.mubr.msk.f32.vlgmr.msra.gmra.mrb[8].mxu1 %vm1476_vm10, %v3587_v21  ;;  %v2017_v21 = vld [vmem:[#allocation4 + $0x88] sm:$0xff] }
 0x6ff   :  { %3123 = vmatprep.mubr.msk.f32.mxu1 %vm3723_vm9, %v3703_v5  ;;  %3226 = vmatpush3.bf16.msra.mxu1 %v3225_v33  ;;  %v3252_v24 = vpack.c.bf16 %v2019_v22, %v2017_v21  ;;  %v2022_v33 = vld [vmem:[#allocation4 + $0xb0] sm:$0xff]  ;;  %v2052_v22 = vld [vmem:[#allocation4 + $0x1a0] sm:$0xff] }
 0x700   :  { %3227 = vmatprep.subr.bf16.mxu1 %v3714_v47 }
 0x703   :  { %3229 = vmatpush3.bf16.msra.mxu1 %v3228_v35  ;;  %v2027_v35 = vld [vmem:[#allocation4 + $0xd8] sm:$0xff] }
 0x704   :  { %2973 = vmatprep.subr.msk.mxu1 %vm1922_vm11, %v1918_v37  ;;  %v3260_v37 = vpack.c.bf16 %v2027_v35, %v2025_v34  ;;  %v2060_v35 = vld [vmem:[#allocation4 + $0x1e0] sm:$0xff] }
 0x7d1   :  { %v1624_v25 = vpop.f32.mrb[8].mxu1 }
 0x7d2   :  { %v1628_v27 = vadd.f32 %v3585_v7, %v1624_v25  ;;  %v3103_v28 = vpop.f32.mrb[9].mxu1  ;;  %v2011_v7 = vld [vmem:[#allocation4 + $0x58] sm:$0xff]  ;;  %v2016_v25 = vld [vmem:[#allocation4 + $0x80] sm:$0xff] }
 0x7d3   :  { %v3244_v13 = vpack.c.bf16 %v2011_v7, %v2009_v6  ;;  %v2023_v28 = vld [vmem:[#allocation4 + $0xb8] sm:$0xff]  ;;  %v3280_v7 = vpack.c.bf16 %v2047_v3, %v2045_v2  ;;  %v2165_v3 = vld [vmem:[#allocation7 + $0x80] sm:$0xff] }
 0x7d4   :  { %v1636_v29 = vadd.f32 %v2955_v26, %v1628_v27  ;;  %v2018_v26 = vld [vmem:[#allocation4 + $0x90] sm:$0xff]  ;;  %v2021_v27 = vld [vmem:[#allocation4 + $0xa8] sm:$0xff] }
 0x7d5   :  { %v3254_v30 = vpack.c.bf16 %v2018_v26, %v2016_v25  ;;  %v3256_v31 = vpack.c.bf16 %v2023_v28, %v2021_v27  ;;  %v2059_v25 = vld [vmem:[#allocation4 + $0x1d8] sm:$0xff] }
 0x7d6   :  { %3113 = vmatmul.mubr.msk.f32.vlgmr.msra.gmra.mrb[4].mxu0 %vm1476_vm10, %v1636_v29 }
 0x7d7   :  { %3134 = vmatprep.mubr.msk.f32.mxu0 %vm3723_vm9, %v3703_v5  ;;  %3232 = vmatpush3.bf16.msra.mxu0 %v3231_v40  ;;  %v2029_v40 = vld [vmem:[#allocation4 + $0xe8] sm:$0xff] }
 0x7d8   :  { %3233 = vmatprep.subr.bf16.mxu0 %v3714_v47  ;;  %v1814_v47 = vld [vmem:[%s4516_s13 + $0x10] sm:$0xff] }
 0x7d9   :  { %v3234_v49 = vpack.c.bf16 %v1815_v46, %v1814_v47  ;;  %v2033_v47 = vld [vmem:[#allocation4 + $0x108] sm:$0xff]  ;;  %v2035_v46 = vld [vmem:[#allocation4 + $0x118] sm:$0xff] }
 0x7db   :  { %3235 = vmatpush3.bf16.msra.mxu0 %v3234_v49  ;;  %v3268_v49 = vpack.c.bf16 %v2035_v46, %v2033_v47  ;;  %v2153_v46 = vld [vmem:[#allocation7 + $0x20] sm:$0xff] }
 0x7dc   :  { %3237 = vmatprep.subr.bf16.mxu0 %v3236_v51  ;;  %v2034_v51 = vld [vmem:[#allocation4 + $0x110] sm:$0xff] }
 0x8a9   :  { %v1719_v42 = vpop.f32.mrb[4].mxu0 }
 0x8aa   :  { %v1720_v43 = vadd.f32 %v2961_v41, %v1719_v42  ;;  %v3114_v44 = vpop.f32.mrb[5].mxu0  ;;  %v2031_v41 = vld [vmem:[#allocation4 + $0xf8] sm:$0xff]  ;;  %v3262_v42 = vpack.c.bf16 %v2026_v39, %v2024_v38  ;;  %v2150_v38 = vld [vmem:[#allocation7 + $0x8] sm:$0xff] }
 0x8ab   :  { %v2028_v44 = vld [vmem:[#allocation4 + $0xe0] sm:$0xff]  ;;  %v2152_v39 = vld [vmem:[#allocation7 + $0x18] sm:$0xff] }
 0x8ac   :  { %3588 = vtanh.f32 %v1720_v43  ;;  %v3264_v43 = vpack.c.bf16 %v2031_v41, %v2029_v40  ;;  %v2149_v40 = vld [vmem:[#allocation7] sm:$0xff]  ;;  %v3300_v41 = vpack.c.bf16 %v2152_v39, %v2150_v38  ;;  %v2190_v38 = vld [vmem:[#allocation7 + $0x148] sm:$0xff]  ;;  %v2192_v39 = vld [vmem:[#allocation7 + $0x158] sm:$0xff] }
 0x8b6   :  { %v3589_v45 = vpop.eup %3588 }
 0x8b7   :  { %3124 = vmatmul.mubr.msk.f32.vlgmr.msra.gmra.mrb[10].mxu1 %vm1476_vm10, %v3589_v45  ;;  %v2030_v45 = vld [vmem:[#allocation4 + $0xf0] sm:$0xff] }
 0x8b8   :  { %2974 = vmatpush1.msk.msra.mxu1 %vm1922_vm11, %v2972_v36  ;;  %1991 = vmatprep.mubr.f32.mxu1 %v3703_v5  ;;  %v3258_v36 = vpack.c.bf16 %v2022_v33, %v2020_v32  ;;  %v3266_v48 = vpack.c.bf16 %v2030_v45, %v2028_v44  ;;  %v2061_v32 = vld [vmem:[#allocation4 + $0x1e8] sm:$0xff]  ;;  %v2063_v33 = vld [vmem:[#allocation4 + $0x1f8] sm:$0xff] }
 0x8b9   :  { %v3296_v34 = vpack.c.bf16 %v2063_v33, %v2061_v32  ;;  %v2156_v44 = vld [vmem:[#allocation7 + $0x38] sm:$0xff]  ;;  %3301 = vmatprep.subr.bf16.mxu1 %v3300_v41  ;;  %v2183_v32 = vld [vmem:[#allocation7 + $0x110] sm:$0xff]  ;;  %v2186_v33 = vld [vmem:[#allocation7 + $0x128] sm:$0xff]  ;;  %v3340_v41 = vpack.c.bf16 %v2192_v39, %v2190_v38 }
 0x8ba   :  { %v2313_v38 = vld [vmem:[#allocation4 + $0x260] sm:$0xff]  ;;  %v2315_v39 = vld [vmem:[#allocation4 + $0x270] sm:$0xff] }
 0x8bb   :  { %2975 = vmatmul.mubr.msk.f32.vlgmr.msra.gmra.mrb[12].mxu1 %vm650_vm3, %v4054_v57  ;;  %v4314_v57 = vld [vmem:[%s4519_s16] sm:$0x3]  ;;  %s3724_s16 = smov 112   ;;  %vm2723_vm3 = vcmask 130048  }
 0x8bc   :  { %v1907_v61 = vrot.slane %v4314_v57, %v3951_v63  ;;  %v1903_v19 = vrot.slane %v4314_v57, %v3948_v62 }
 0x98a   :  { %v1798_v54 = vpop.f32.mrb[10].mxu1 }
 0x98b   :  { %v1802_v58 = vadd.f32 %v1798_v54, %v1636_v29  ;;  %v3125_v59 = vpop.f32.mrb[11].mxu1  ;;  %v3270_v54 = vpack.c.bf16 %v2034_v51, %v2032_v50  ;;  %v2160_v50 = vld [vmem:[#allocation7 + $0x58] sm:$0xff] }
 0x98c   :  { %v2043_v59 = vld [vmem:[#allocation4 + $0x158] sm:$0xff] }
 0x98d   :  { %v1811_v0 = vadd.f32 %v2969_v4, %v1802_v58  ;;  %v3272_v4 = vpack.c.bf16 %v2039_v53, %v2037_v52  ;;  %v2041_v58 = vld [vmem:[#allocation4 + $0x148] sm:$0xff]  ;;  %v2157_v53 = vld [vmem:[#allocation7 + $0x40] sm:$0xff] }
 0x98e   :  { %v4321_v8 = vpop.f32.mrb[12].mxu1 }
 0x98f   :  { %3135 = vmatmul.mubr.msk.f32.vlgmr.msra.gmra.mrb[6].mxu0 %vm1476_vm10, %v1811_v0  ;;  %v1995_v9 = vpop.f32.mrb[13].mxu1  ;;  %v2040_v0 = vld [vmem:[#allocation4 + $0x140] sm:$0xff]  ;;  %v1994_v26 = vadd.f32 %v4321_v8, %v1903_v19  ;;  %v2175_v19 = vld [vmem:[#allocation7 + $0xd0] sm:$0xff] }
 0x990   :  { %3239 = vmatpush1.bf16.msra.mxu0 %v3238_v60  ;;  %v1996_v12 = vadd.f32 %v1995_v9, %v1907_v61  ;;  %v3274_v60 = vpack.c.bf16 %v2038_v56, %v2036_v55  ;;  %v3276_v61 = vpack.c.bf16 %v2043_v59, %v2041_v58  ;;  %v2044_v9 = vld [vmem:[#allocation4 + $0x160] sm:$0xff]  ;;  %v2164_v55 = vld [vmem:[#allocation7 + $0x78] sm:$0xff] }
 0x991   :  { %3241 = vmatprep.subr.bf16.mxu0 %v3240_v1  ;;  %v2042_v1 = vld [vmem:[#allocation4 + $0x150] sm:$0xff]  ;;  %v2161_v59 = vld [vmem:[#allocation7 + $0x60] sm:$0xff] }
 0x992   :  { %3590 = vtanh.f32 %v1996_v12  ;;  %v3278_v6 = vpack.c.bf16 %v2042_v1, %v2040_v0  ;;  %v2049_v12 = vld [vmem:[#allocation4 + $0x188] sm:$0xff]  ;;  %v2168_v0 = vld [vmem:[#allocation7 + $0x98] sm:$0xff] }
 0x993   :  { %3592 = vtanh.f32 %v1994_v26  ;;  %v2182_v26 = vld [vmem:[#allocation7 + $0x108] sm:$0xff] }
 0x994   :  { %3243 = vmatpush1.bf16.msra.mxu0 %v3242_v10  ;;  %v2046_v10 = vld [vmem:[#allocation4 + $0x170] sm:$0xff] }
 0x995   :  { %3245 = vmatprep.subr.bf16.mxu0 %v3244_v13  ;;  %v2051_v13 = vld [vmem:[#allocation4 + $0x198] sm:$0xff]  ;;  %v3282_v14 = vpack.c.bf16 %v2046_v10, %v2044_v9 }
 0x996   :  { %v3284_v15 = vpack.c.bf16 %v2051_v13, %v2049_v12  ;;  %v2172_v9 = vld [vmem:[#allocation7 + $0xb8] sm:$0xff]  ;;  %v2169_v13 = vld [vmem:[#allocation7 + $0xa0] sm:$0xff] }
 0x998   :  { %3247 = vmatpush1.bf16.msra.mxu0 %v3246_v17  ;;  %v2053_v17 = vld [vmem:[#allocation4 + $0x1a8] sm:$0xff] }
 0x999   :  { %3249 = vmatprep.subr.bf16.mxu0 %v3248_v18  ;;  %v2055_v18 = vld [vmem:[#allocation4 + $0x1b8] sm:$0xff] }
 0x99a   :  { %v3288_v21 = vpack.c.bf16 %v2055_v18, %v2053_v17  ;;  %v2173_v18 = vld [vmem:[#allocation7 + $0xc0] sm:$0xff] }
 0x99c   :  { %v4324_v29 = vpop.eup %3590  ;;  %3251 = vmatpush1.bf16.msra.mxu0 %v3250_v23  ;;  %v2054_v23 = vld [vmem:[#allocation4 + $0x1b0] sm:$0xff] }
 0x99d   :  { %3253 = vmatprep.subr.bf16.mxu0 %v3252_v24  ;;  %2140 = vmatprep.mubr.f32.mxu0 %v4324_v29  ;;  %v2057_v24 = vld [vmem:[#allocation4 + $0x1c8] sm:$0xff]  ;;  %v3290_v27 = vpack.c.bf16 %v2054_v23, %v2052_v22  ;;  %v4330_v8 = vpop.eup %3592  ;;  %v3326_v22 = vpack.c.bf16 %v2175_v19, %v2173_v18  ;;  %v2301_v18 = vld [vmem:[#allocation4 + $0x200] sm:$0xff] }
 0x99e   :  { %v3292_v28 = vpack.c.bf16 %v2059_v25, %v2057_v24  ;;  %v2177_v24 = vld [vmem:[#allocation7 + $0xe0] sm:$0xff]  ;;  %v2179_v25 = vld [vmem:[#allocation7 + $0xf0] sm:$0xff] }
 0x9a0   :  { %3255 = vmatpush1.bf16.msra.mxu0 %v3254_v30  ;;  %v2056_v30 = vld [vmem:[#allocation4 + $0x1c0] sm:$0xff] }
 0x9a1   :  { %3257 = vmatprep.subr.bf16.mxu0 %v3256_v31  ;;  %v2058_v31 = vld [vmem:[#allocation4 + $0x1d0] sm:$0xff] }
 0x9a2   :  { %v3294_v57 = vpack.c.bf16 %v2058_v31, %v2056_v30  ;;  %v2181_v31 = vld [vmem:[#allocation7 + $0x100] sm:$0xff] }
 0x9a4   :  { %3259 = vmatpush1.bf16.msra.mxu0 %v3258_v36  ;;  %v2062_v36 = vld [vmem:[#allocation4 + $0x1f0] sm:$0xff] }
 0x9a5   :  { %3261 = vmatprep.subr.bf16.mxu0 %v3260_v37  ;;  %v3298_v37 = vpack.c.bf16 %v2062_v36, %v2060_v35  ;;  %v2185_v36 = vld [vmem:[#allocation7 + $0x120] sm:$0xff] }
 0x9a8   :  { %3263 = vmatpush1.bf16.msra.mxu0 %v3262_v42  ;;  %v2151_v42 = vld [vmem:[#allocation7 + $0x10] sm:$0xff] }
 0x9a9   :  { %3265 = vmatprep.subr.bf16.mxu0 %v3264_v43  ;;  %v2154_v43 = vld [vmem:[#allocation7 + $0x28] sm:$0xff]  ;;  %v3302_v45 = vpack.c.bf16 %v2151_v42, %v2149_v40  ;;  %v2189_v42 = vld [vmem:[#allocation7 + $0x140] sm:$0xff] }
 0x9aa   :  { %v3304_v47 = vpack.c.bf16 %v2156_v44, %v2154_v43  ;;  %v2191_v43 = vld [vmem:[#allocation7 + $0x150] sm:$0xff]  ;;  %v2194_v44 = vld [vmem:[#allocation7 + $0x168] sm:$0xff] }
 0x9ab   :  { %3303 = vmatpush1.bf16.msra.mxu1 %v3302_v45  ;;  %v2196_v45 = vld [vmem:[#allocation7 + $0x178] sm:$0xff] }
 0x9ac   :  { %3267 = vmatpush1.bf16.msra.mxu0 %v3266_v48  ;;  %v2155_v48 = vld [vmem:[#allocation7 + $0x30] sm:$0xff]  ;;  %3305 = vmatprep.subr.bf16.mxu1 %v3304_v47  ;;  %v3342_v47 = vpack.c.bf16 %v2191_v43, %v2189_v42 }
 0x9ad   :  { %3269 = vmatprep.subr.bf16.mxu0 %v3268_v49  ;;  %v2158_v49 = vld [vmem:[#allocation7 + $0x48] sm:$0xff]  ;;  %v3306_v51 = vpack.c.bf16 %v2155_v48, %v2153_v46  ;;  %v3344_v46 = vpack.c.bf16 %v2196_v45, %v2194_v44  ;;  %v2193_v48 = vld [vmem:[#allocation7 + $0x160] sm:$0xff]  ;;  %v3378_v45 = vpack.c.bf16 %v2315_v39, %v2313_v38  ;;  %v2356_v39 = vld [vmem:[#allocation4 + $0x3b8] sm:$0xff] }
 0x9ae   :  { %v3308_v52 = vpack.c.bf16 %v2160_v50, %v2158_v49  ;;  %v2195_v49 = vld [vmem:[#allocation7 + $0x170] sm:$0xff]  ;;  %v2354_v38 = vld [vmem:[#allocation4 + $0x3a8] sm:$0xff] }
 0x9af   :  { %3307 = vmatpush1.bf16.msra.mxu1 %v3306_v51  ;;  %v3346_v50 = vpack.c.bf16 %v2195_v49, %v2193_v48  ;;  %v2198_v51 = vld [vmem:[#allocation7 + $0x188] sm:$0xff]  ;;  %v2319_v48 = vld [vmem:[#allocation4 + $0x290] sm:$0xff] }
 0x9b0   :  { %3271 = vmatpush1.bf16.msra.mxu0 %v3270_v54  ;;  %v2159_v54 = vld [vmem:[#allocation7 + $0x50] sm:$0xff]  ;;  %3309 = vmatprep.subr.bf16.mxu1 %v3308_v52  ;;  %v2200_v52 = vld [vmem:[#allocation7 + $0x198] sm:$0xff]  ;;  %v2322_v49 = vld [vmem:[#allocation4 + $0x2a8] sm:$0xff] }
 0x9b1   :  { %3273 = vmatprep.subr.bf16.mxu0 %v3272_v4  ;;  %v2162_v4 = vld [vmem:[#allocation7 + $0x68] sm:$0xff]  ;;  %v3310_v56 = vpack.c.bf16 %v2159_v54, %v2157_v53  ;;  %v3348_v53 = vpack.c.bf16 %v2200_v52, %v2198_v51  ;;  %v2197_v54 = vld [vmem:[#allocation7 + $0x180] sm:$0xff] }
 0x9b2   :  { %v3312_v58 = vpack.c.bf16 %v2164_v55, %v2162_v4  ;;  %v2199_v4 = vld [vmem:[#allocation7 + $0x190] sm:$0xff] }
 0x9b3   :  { %3311 = vmatpush1.bf16.msra.mxu1 %v3310_v56  ;;  %v3350_v55 = vpack.c.bf16 %v2199_v4, %v2197_v54  ;;  %v2202_v56 = vld [vmem:[#allocation7 + $0x1a8] sm:$0xff]  ;;  %v2323_v54 = vld [vmem:[#allocation4 + $0x2b0] sm:$0xff] }
 0x9b4   :  { %3275 = vmatpush1.bf16.msra.mxu0 %v3274_v60  ;;  %v2163_v60 = vld [vmem:[#allocation7 + $0x70] sm:$0xff]  ;;  %3313 = vmatprep.subr.bf16.mxu1 %v3312_v58  ;;  %v2204_v58 = vld [vmem:[#allocation7 + $0x1b8] sm:$0xff]  ;;  %v2326_v4 = vld [vmem:[#allocation4 + $0x2c8] sm:$0xff] }
 0x9b5   :  { %3277 = vmatprep.subr.bf16.mxu0 %v3276_v61  ;;  %v2166_v61 = vld [vmem:[#allocation7 + $0x88] sm:$0xff]  ;;  %v3314_v1 = vpack.c.bf16 %v2163_v60, %v2161_v59  ;;  %v2201_v59 = vld [vmem:[#allocation7 + $0x1a0] sm:$0xff]  ;;  %v3352_v60 = vpack.c.bf16 %v2204_v58, %v2202_v56 }
 0x9b6   :  { %v3316_v2 = vpack.c.bf16 %v2168_v0, %v2166_v61  ;;  %v2203_v61 = vld [vmem:[#allocation7 + $0x1b0] sm:$0xff]  ;;  %v2206_v0 = vld [vmem:[#allocation7 + $0x1c8] sm:$0xff] }
 0x9b7   :  { %3315 = vmatpush1.bf16.msra.mxu1 %v3314_v1  ;;  %v2208_v1 = vld [vmem:[#allocation7 + $0x1d8] sm:$0xff] }
 0x9b8   :  { %3279 = vmatpush1.bf16.msra.mxu0 %v3278_v6  ;;  %v2167_v6 = vld [vmem:[#allocation7 + $0x90] sm:$0xff]  ;;  %3317 = vmatprep.subr.bf16.mxu1 %v3316_v2  ;;  %v3354_v2 = vpack.c.bf16 %v2203_v61, %v2201_v59  ;;  %v2325_v59 = vld [vmem:[#allocation4 + $0x2c0] sm:$0xff]  ;;  %v2330_v61 = vld [vmem:[#allocation4 + $0x2e8] sm:$0xff] }
 0x9b9   :  { %3281 = vmatprep.subr.bf16.mxu0 %v3280_v7  ;;  %v2170_v7 = vld [vmem:[#allocation7 + $0xa8] sm:$0xff]  ;;  %v3318_v10 = vpack.c.bf16 %v2167_v6, %v2165_v3  ;;  %v3356_v3 = vpack.c.bf16 %v2208_v1, %v2206_v0  ;;  %v2205_v6 = vld [vmem:[#allocation7 + $0x1c0] sm:$0xff]  ;;  %v2332_v0 = vld [vmem:[#allocation4 + $0x2f8] sm:$0xff] }
 0x9ba   :  { %v3320_v12 = vpack.c.bf16 %v2172_v9, %v2170_v7  ;;  %v2207_v7 = vld [vmem:[#allocation7 + $0x1d0] sm:$0xff]  ;;  %v2210_v9 = vld [vmem:[#allocation7 + $0x1e8] sm:$0xff] }
 0x9bb   :  { %3319 = vmatpush1.bf16.msra.mxu1 %v3318_v10  ;;  %v2212_v10 = vld [vmem:[#allocation7 + $0x1f8] sm:$0xff] }
 0x9bc   :  { %3283 = vmatpush1.bf16.msra.mxu0 %v3282_v14  ;;  %v2171_v14 = vld [vmem:[#allocation7 + $0xb0] sm:$0xff]  ;;  %3321 = vmatprep.subr.bf16.mxu1 %v3320_v12  ;;  %v3358_v12 = vpack.c.bf16 %v2207_v7, %v2205_v6  ;;  %v2334_v7 = vld [vmem:[#allocation4 + $0x308] sm:$0xff] }
 0x9bd   :  { %3285 = vmatprep.subr.bf16.mxu0 %v3284_v15  ;;  %v2174_v15 = vld [vmem:[#allocation7 + $0xc8] sm:$0xff]  ;;  %v3322_v16 = vpack.c.bf16 %v2171_v14, %v2169_v13  ;;  %v3360_v13 = vpack.c.bf16 %v2212_v10, %v2210_v9  ;;  %v2209_v14 = vld [vmem:[#allocation7 + $0x1e0] sm:$0xff]  ;;  %v2331_v6 = vld [vmem:[#allocation4 + $0x2f0] sm:$0xff] }
 0x9be   :  { %v3324_v17 = vpack.c.bf16 %v2176_v11, %v2174_v15  ;;  %v2211_v15 = vld [vmem:[#allocation7 + $0x1f0] sm:$0xff]  ;;  %v2336_v9 = vld [vmem:[#allocation4 + $0x318] sm:$0xff] }
 0x9bf   :  { %3323 = vmatpush1.bf16.msra.mxu1 %v3322_v16  ;;  %v3362_v11 = vpack.c.bf16 %v2211_v15, %v2209_v14  ;;  %v2302_v16 = vld [vmem:[#allocation4 + $0x208] sm:$0xff]  ;;  %v2335_v14 = vld [vmem:[#allocation4 + $0x310] sm:$0xff] }
 0x9c0   :  { %3287 = vmatpush1.bf16.msra.mxu0 %v3286_v20  ;;  %v2178_v20 = vld [vmem:[#allocation7 + $0xe8] sm:$0xff]  ;;  %3325 = vmatprep.subr.bf16.mxu1 %v3324_v17  ;;  %v2304_v17 = vld [vmem:[#allocation4 + $0x218] sm:$0xff] }
 0x9c1   :  { %3289 = vmatprep.subr.bf16.mxu0 %v3288_v21  ;;  %v2180_v21 = vld [vmem:[#allocation7 + $0xf8] sm:$0xff]  ;;  %v3364_v19 = vpack.c.bf16 %v2304_v17, %v2302_v16  ;;  %v2338_v15 = vld [vmem:[#allocation4 + $0x328] sm:$0xff] }
 0x9c2   :  { %v3328_v23 = vpack.c.bf16 %v2180_v21, %v2178_v20  ;;  %v2303_v20 = vld [vmem:[#allocation4 + $0x210] sm:$0xff]  ;;  %v2306_v21 = vld [vmem:[#allocation4 + $0x228] sm:$0xff] }
 0x9c3   :  { %3327 = vmatpush1.bf16.msra.mxu1 %v3326_v22  ;;  %v2308_v22 = vld [vmem:[#allocation4 + $0x238] sm:$0xff] }
 0x9c4   :  { %3291 = vmatpush1.bf16.msra.mxu0 %v3290_v27  ;;  %v2184_v27 = vld [vmem:[#allocation7 + $0x118] sm:$0xff]  ;;  %3329 = vmatprep.subr.bf16.mxu1 %v3328_v23  ;;  %v3366_v23 = vpack.c.bf16 %v2303_v20, %v2301_v18  ;;  %v2337_v18 = vld [vmem:[#allocation4 + $0x320] sm:$0xff]  ;;  %v2342_v20 = vld [vmem:[#allocation4 + $0x348] sm:$0xff] }
 0x9c5   :  { %3293 = vmatprep.subr.bf16.mxu0 %v3292_v28  ;;  %v3330_v28 = vpack.c.bf16 %v2179_v25, %v2177_v24  ;;  %v3332_v30 = vpack.c.bf16 %v2184_v27, %v2182_v26  ;;  %v3368_v24 = vpack.c.bf16 %v2308_v22, %v2306_v21  ;;  %v2305_v25 = vld [vmem:[#allocation4 + $0x220] sm:$0xff]  ;;  %v2307_v26 = vld [vmem:[#allocation4 + $0x230] sm:$0xff]  ;;  %v2310_v27 = vld [vmem:[#allocation4 + $0x248] sm:$0xff] }
 0x9c6   :  { %v2344_v21 = vld [vmem:[#allocation4 + $0x358] sm:$0xff] }
 0x9c7   :  { %3331 = vmatpush1.bf16.msra.mxu1 %v3330_v28  ;;  %v2312_v28 = vld [vmem:[#allocation4 + $0x258] sm:$0xff] }
 0x9c8   :  { %3295 = vmatpush1.bf16.msra.mxu0 %v3294_v57  ;;  %v2188_v57 = vld [vmem:[#allocation7 + $0x138] sm:$0xff]  ;;  %3333 = vmatprep.subr.bf16.mxu1 %v3332_v30  ;;  %v3370_v30 = vpack.c.bf16 %v2307_v26, %v2305_v25  ;;  %v2343_v25 = vld [vmem:[#allocation4 + $0x350] sm:$0xff]  ;;  %v2346_v26 = vld [vmem:[#allocation4 + $0x368] sm:$0xff] }
 0x9c9   :  { %3297 = vmatprep.subr.bf16.mxu0 %v3296_v34  ;;  %v3334_v34 = vpack.c.bf16 %v2183_v32, %v2181_v31  ;;  %v3336_v35 = vpack.c.bf16 %v2188_v57, %v2186_v33  ;;  %v3372_v31 = vpack.c.bf16 %v2312_v28, %v2310_v27  ;;  %v2309_v32 = vld [vmem:[#allocation4 + $0x240] sm:$0xff]  ;;  %v2311_v33 = vld [vmem:[#allocation4 + $0x250] sm:$0xff]  ;;  %v2314_v57 = vld [vmem:[#allocation4 + $0x268] sm:$0xff] }
 0x9ca   :  { %v2348_v27 = vld [vmem:[#allocation4 + $0x378] sm:$0xff] }
 0x9cb   :  { %3335 = vmatpush1.bf16.msra.mxu1 %v3334_v34  ;;  %v2316_v34 = vld [vmem:[#allocation4 + $0x278] sm:$0xff] }
 0x9cc   :  { %3299 = vmatpush1.bf16.msra.mxu0 %v3298_v37  ;;  %v2187_v37 = vld [vmem:[#allocation7 + $0x130] sm:$0xff]  ;;  %3337 = vmatprep.subr.bf16.mxu1 %v3336_v35  ;;  %v3374_v35 = vpack.c.bf16 %v2311_v33, %v2309_v32  ;;  %v2350_v33 = vld [vmem:[#allocation4 + $0x388] sm:$0xff] }
 0x9cd   :  { %v3338_v40 = vpack.c.bf16 %v2187_v37, %v2185_v36  ;;  %3365 = vmatprep.subr.bf16.mxu0 %v3364_v19  ;;  %v2970_v36 = vld [vmem:[%s4517_s14] ss:$0 sm:$0xff]  ;;  %v3376_v37 = vpack.c.bf16 %v2316_v34, %v2314_v57  ;;  %v2352_v57 = vld [vmem:[#allocation4 + $0x398] sm:$0xff] }
 0x9ce   :  { %v2339_v19 = vld [vmem:[#allocation4 + $0x330] sm:$0xff] }
 0x9cf   :  { %2141 = vmatmul.mubr.f32.vlgmr.msra.gmra.mrb[8].mxu0 %v4330_v8  ;;  %3339 = vmatpush1.bf16.msra.mxu1 %v3338_v40  ;;  %v2318_v40 = vld [vmem:[#allocation4 + $0x288] sm:$0xff]  ;;  %v3402_v22 = vpack.c.bf16 %v2339_v19, %v2337_v18  ;;  %v2347_v32 = vld [vmem:[#allocation4 + $0x370] sm:$0xff] }
 0x9d0   :  { %3341 = vmatprep.subr.bf16.mxu1 %v3340_v41  ;;  %3367 = vmatpush1.bf16.msra.mxu0 %v3366_v23  ;;  %v2320_v41 = vld [vmem:[#allocation4 + $0x298] sm:$0xff]  ;;  %v3404_v23 = vpack.c.bf16 %v2344_v21, %v2342_v20  ;;  %v2458_v18 = vld [vmem:[#allocation7 + $0x230] sm:$0xff]  ;;  %v2461_v19 = vld [vmem:[#allocation7 + $0x248] sm:$0xff] }
 0x9d1   :  { %3369 = vmatprep.subr.bf16.mxu0 %v3368_v24  ;;  %v2341_v24 = vld [vmem:[#allocation4 + $0x340] sm:$0xff]  ;;  %v2463_v20 = vld [vmem:[#allocation7 + $0x258] sm:$0xff] }
 0x9d2   :  { %v3406_v28 = vpack.c.bf16 %v2343_v25, %v2341_v24  ;;  %v2462_v24 = vld [vmem:[#allocation7 + $0x250] sm:$0xff]  ;;  %v2465_v25 = vld [vmem:[#allocation7 + $0x268] sm:$0xff] }
 0x9d3   :  { %3343 = vmatpush1.bf16.msra.mxu1 %v3342_v47  ;;  %v3380_v47 = vpack.c.bf16 %v2320_v41, %v2318_v40  ;;  %v3416_v41 = vpack.c.bf16 %v2356_v39, %v2354_v38  ;;  %v2475_v38 = vld [vmem:[#allocation7 + $0x2b8] sm:$0xff] }
 0x9d4   :  { %3345 = vmatprep.subr.bf16.mxu1 %v3344_v46  ;;  %3371 = vmatpush1.bf16.msra.mxu0 %v3370_v30  ;;  %v2317_v46 = vld [vmem:[#allocation4 + $0x280] sm:$0xff]  ;;  %v3408_v30 = vpack.c.bf16 %v2348_v27, %v2346_v26  ;;  %v2467_v26 = vld [vmem:[#allocation7 + $0x278] sm:$0xff] }
 0x9d5   :  { %3373 = vmatprep.subr.bf16.mxu0 %v3372_v31  ;;  %v3382_v51 = vpack.c.bf16 %v2319_v48, %v2317_v46  ;;  %v2345_v31 = vld [vmem:[#allocation4 + $0x360] sm:$0xff] }
 0x9d6   :  { %v3410_v34 = vpack.c.bf16 %v2347_v32, %v2345_v31  ;;  %v2466_v31 = vld [vmem:[#allocation7 + $0x270] sm:$0xff]  ;;  %v2469_v32 = vld [vmem:[#allocation7 + $0x288] sm:$0xff] }
 0x9d7   :  { %3347 = vmatpush1.bf16.msra.mxu1 %v3346_v50  ;;  %v2324_v50 = vld [vmem:[#allocation4 + $0x2b8] sm:$0xff] }
 0x9d8   :  { %3349 = vmatprep.subr.bf16.mxu1 %v3348_v53  ;;  %3375 = vmatpush1.bf16.msra.mxu0 %v3374_v35  ;;  %v3384_v52 = vpack.c.bf16 %v2324_v50, %v2322_v49  ;;  %v2321_v53 = vld [vmem:[#allocation4 + $0x2a0] sm:$0xff]  ;;  %v3412_v35 = vpack.c.bf16 %v2352_v57, %v2350_v33  ;;  %v2064_v49 = vld [vmem:[%s4521_s18] sm:$0x3]  ;;  %v2471_v33 = vld [vmem:[#allocation7 + $0x298] sm:$0xff] }
 0x9d9   :  { %3377 = vmatprep.subr.bf16.mxu0 %v3376_v37  ;;  %v3386_v56 = vpack.c.bf16 %v2323_v54, %v2321_v53  ;;  %v2351_v37 = vld [vmem:[#allocation4 + $0x390] sm:$0xff]  ;;  %v2069_v50 = vrot.slane %v2064_v49, %v3948_v62 }
 0x9db   :  { %3351 = vmatpush1.bf16.msra.mxu1 %v3350_v55  ;;  %v2328_v55 = vld [vmem:[#allocation4 + $0x2d8] sm:$0xff] }
 0x9dc   :  { %3353 = vmatprep.subr.bf16.mxu1 %v3352_v60  ;;  %3379 = vmatpush1.bf16.msra.mxu0 %v3378_v45  ;;  %v3388_v58 = vpack.c.bf16 %v2328_v55, %v2326_v4  ;;  %v2327_v60 = vld [vmem:[#allocation4 + $0x2d0] sm:$0xff]  ;;  %v2358_v45 = vld [vmem:[#allocation4 + $0x3c8] sm:$0xff] }
 0x9dd   :  { %3381 = vmatprep.subr.bf16.mxu0 %v3380_v47  ;;  %v3390_v1 = vpack.c.bf16 %v2327_v60, %v2325_v59  ;;  %v2360_v47 = vld [vmem:[#allocation4 + $0x3d8] sm:$0xff]  ;;  %v2359_v59 = vld [vmem:[#allocation4 + $0x3d0] sm:$0xff] }
 0x9de   :  { %v3420_v48 = vpack.c.bf16 %v2360_v47, %v2358_v45  ;;  %v2479_v45 = vld [vmem:[#allocation7 + $0x2d8] sm:$0xff] }
 0x9df   :  { %3355 = vmatpush1.bf16.msra.mxu1 %v3354_v2  ;;  %v3392_v2 = vpack.c.bf16 %v2332_v0, %v2330_v61  ;;  %v2362_v61 = vld [vmem:[#allocation4 + $0x3e8] sm:$0xff]  ;;  %v2364_v0 = vld [vmem:[#allocation4 + $0x3f8] sm:$0xff] }
 0x9e0   :  { %3357 = vmatprep.subr.bf16.mxu1 %v3356_v3  ;;  %3383 = vmatpush1.bf16.msra.mxu0 %v3382_v51  ;;  %v2329_v3 = vld [vmem:[#allocation4 + $0x2e0] sm:$0xff]  ;;  %v2073_v51 = vrot.slane %v2064_v49, %v3951_v63  ;;  %v2478_v49 = vld [vmem:[#allocation7 + $0x2d0] sm:$0xff] }
 0x9e1   :  { %3385 = vmatprep.subr.bf16.mxu0 %v3384_v52  ;;  %v3394_v10 = vpack.c.bf16 %v2331_v6, %v2329_v3  ;;  %v2363_v3 = vld [vmem:[#allocation4 + $0x3f0] sm:$0xff] }
 0x9e3   :  { %3359 = vmatpush1.bf16.msra.mxu1 %v3358_v12  ;;  %v3396_v12 = vpack.c.bf16 %v2336_v9, %v2334_v7  ;;  %v2453_v7 = vld [vmem:[#allocation7 + $0x208] sm:$0xff]  ;;  %v2455_v9 = vld [vmem:[#allocation7 + $0x218] sm:$0xff] }
 0x9e4   :  { %3361 = vmatprep.subr.bf16.mxu1 %v3360_v13  ;;  %3387 = vmatpush1.bf16.msra.mxu0 %v3386_v56  ;;  %v2333_v13 = vld [vmem:[#allocation4 + $0x300] sm:$0xff] }
 0x9e5   :  { %3389 = vmatprep.subr.bf16.mxu0 %v3388_v58  ;;  %v3398_v16 = vpack.c.bf16 %v2335_v14, %v2333_v13  ;;  %v2357_v58 = vld [vmem:[#allocation4 + $0x3c0] sm:$0xff]  ;;  %v2454_v13 = vld [vmem:[#allocation7 + $0x210] sm:$0xff]  ;;  %v2457_v14 = vld [vmem:[#allocation7 + $0x228] sm:$0xff] }
 0x9e6   :  { %v3422_v60 = vpack.c.bf16 %v2359_v59, %v2357_v58 }
 0x9e7   :  { %3363 = vmatpush1.bf16.msra.mxu1 %v3362_v11  ;;  %v2340_v11 = vld [vmem:[#allocation4 + $0x338] sm:$0xff] }
 0x9e8   :  { %3391 = vmatpush1.bf16.msra.mxu0 %v3390_v1  ;;  %v3400_v17 = vpack.c.bf16 %v2340_v11, %v2338_v15  ;;  %v2361_v1 = vld [vmem:[#allocation4 + $0x3e0] sm:$0xff]  ;;  %v2459_v15 = vld [vmem:[#allocation7 + $0x238] sm:$0xff] }
 0x9e9   :  { %3393 = vmatprep.subr.bf16.mxu0 %v3392_v2  ;;  %v3424_v2 = vpack.c.bf16 %v2364_v0, %v2362_v61  ;;  %v3426_v6 = vpack.c.bf16 %v2363_v3, %v2361_v1  ;;  %v2486_v61 = vld [vmem:[#allocation7 + $0x310] sm:$0xff]  ;;  %v2489_v0 = vld [vmem:[#allocation7 + $0x328] sm:$0xff]  ;;  %v2491_v1 = vld [vmem:[#allocation7 + $0x338] sm:$0xff] }
 0x9ea   :  { %v3464_v3 = vpack.c.bf16 %v2491_v1, %v2489_v0  ;;  %v2606_v1 = vld [vmem:[%s4524_s21 + $0x10] sm:$0xff] }
 0x9ec   :  { %3395 = vmatpush1.bf16.msra.mxu0 %v3394_v10  ;;  %v2452_v10 = vld [vmem:[#allocation7 + $0x200] sm:$0xff] }
 0x9ed   :  { %3397 = vmatprep.subr.bf16.mxu0 %v3396_v12  ;;  %v3428_v12 = vpack.c.bf16 %v2455_v9, %v2453_v7  ;;  %v3430_v11 = vpack.c.bf16 %v2454_v13, %v2452_v10  ;;  %v2490_v7 = vld [vmem:[#allocation7 + $0x330] sm:$0xff]  ;;  %v2493_v9 = vld [vmem:[#allocation7 + $0x348] sm:$0xff]  ;;  %v2495_v10 = vld [vmem:[#allocation7 + $0x358] sm:$0xff] }
 0x9ee   :  { %v3468_v13 = vpack.c.bf16 %v2495_v10, %v2493_v9  ;;  %v2608_v10 = vld [vmem:[%s4524_s21 + $0x20] sm:$0xff] }
 0x9ef   :  { %3429 = vmatprep.subr.bf16.mxu1 %v3428_v12 }
 0x9f0   :  { %3399 = vmatpush1.bf16.msra.mxu0 %v3398_v16  ;;  %v3432_v16 = vpack.c.bf16 %v2459_v15, %v2457_v14  ;;  %v2492_v14 = vld [vmem:[#allocation7 + $0x340] sm:$0xff]  ;;  %v2494_v15 = vld [vmem:[#allocation7 + $0x350] sm:$0xff] }
 0x9f1   :  { %3401 = vmatprep.subr.bf16.mxu0 %v3400_v17  ;;  %v2456_v17 = vld [vmem:[#allocation7 + $0x220] sm:$0xff] }
 0x9f2   :  { %v3434_v21 = vpack.c.bf16 %v2458_v18, %v2456_v17  ;;  %v3470_v17 = vpack.c.bf16 %v2494_v15, %v2492_v14  ;;  %v2627_v14 = vld [vmem:[%s4524_s21 + $0xb8] sm:$0xff] }
 0x9f4   :  { %3403 = vmatpush1.bf16.msra.mxu0 %v3402_v22  ;;  %v3436_v22 = vpack.c.bf16 %v2463_v20, %v2461_v19  ;;  %v2496_v19 = vld [vmem:[#allocation7 + $0x360] sm:$0xff]  ;;  %v2498_v20 = vld [vmem:[#allocation7 + $0x370] sm:$0xff] }
 0x9f5   :  { %3405 = vmatprep.subr.bf16.mxu0 %v3404_v23  ;;  %v2460_v23 = vld [vmem:[#allocation7 + $0x240] sm:$0xff] }
 0x9f6   :  { %v3438_v27 = vpack.c.bf16 %v2462_v24, %v2460_v23 }
 0x9f8   :  { %3407 = vmatpush1.bf16.msra.mxu0 %v3406_v28  ;;  %v3440_v28 = vpack.c.bf16 %v2467_v26, %v2465_v25 }
 0x9f9   :  { %3409 = vmatprep.subr.bf16.mxu0 %v3408_v30  ;;  %v2464_v30 = vld [vmem:[#allocation7 + $0x260] sm:$0xff] }
 0x9fa   :  { %v3442_v57 = vpack.c.bf16 %v2466_v31, %v2464_v30 }
 0x9fc   :  { %3411 = vmatpush1.bf16.msra.mxu0 %v3410_v34  ;;  %v3444_v34 = vpack.c.bf16 %v2471_v33, %v2469_v32  ;;  %v2501_v32 = vld [vmem:[#allocation7 + $0x388] sm:$0xff]  ;;  %v2503_v33 = vld [vmem:[#allocation7 + $0x398] sm:$0xff] }
 0x9fd   :  { %3413 = vmatprep.subr.bf16.mxu0 %v3412_v35  ;;  %v2468_v35 = vld [vmem:[#allocation7 + $0x280] sm:$0xff] }
 0xa62   :  { %v1892_v42 = vpop.f32.mrb[6].mxu0 }
 0xa63   :  { %v4336_v43 = vadd.f32 %v2970_v36, %v1892_v42  ;;  %v3136_v44 = vpop.f32.mrb[7].mxu0  ;;  %v2349_v36 = vld [vmem:[#allocation4 + $0x380] sm:$0xff] }
 0xa64   :  { %v3414_v40 = vpack.c.bf16 %v2351_v37, %v2349_v36  ;;  %v2353_v42 = vld [vmem:[#allocation4 + $0x3a0] sm:$0xff]  ;;  %v2355_v44 = vld [vmem:[#allocation4 + $0x3b0] sm:$0xff]  ;;  %v2473_v37 = vld [vmem:[#allocation7 + $0x2a8] sm:$0xff] }
 0xa65   :  { %2800 = vrot.lane.b32.xlu1 %v4336_v43, %s3724_s16  ;;  %v3418_v46 = vpack.c.bf16 %v2355_v44, %v2353_v42  ;;  %v2470_v36 = vld [vmem:[#allocation7 + $0x290] sm:$0xff]  ;;  %v2477_v44 = vld [vmem:[#allocation7 + $0x2c8] sm:$0xff] }
 0xa66   :  { %3415 = vmatpush1.bf16.msra.mxu0 %v3414_v40  ;;  %v3446_v39 = vpack.c.bf16 %v2470_v36, %v2468_v35  ;;  %v3448_v40 = vpack.c.bf16 %v2475_v38, %v2473_v37  ;;  %v2474_v42 = vld [vmem:[#allocation7 + $0x2b0] sm:$0xff]  ;;  %v2507_v37 = vld [vmem:[#allocation7 + $0x3b8] sm:$0xff]  ;;  %v2504_v38 = vld [vmem:[#allocation7 + $0x3a0] sm:$0xff] }
 0xa67   :  { %3417 = vmatprep.subr.bf16.mxu0 %v3416_v41  ;;  %v2472_v41 = vld [vmem:[#allocation7 + $0x2a0] sm:$0xff]  ;;  %v2502_v35 = vld [vmem:[#allocation7 + $0x390] sm:$0xff] }
 0xa68   :  { %v3450_v47 = vpack.c.bf16 %v2474_v42, %v2472_v41  ;;  %v2511_v41 = vld [vmem:[#allocation7 + $0x3d8] sm:$0xff] }
 0xa6a   :  { %3419 = vmatpush1.bf16.msra.mxu0 %v3418_v46  ;;  %v3452_v46 = vpack.c.bf16 %v2479_v45, %v2477_v44  ;;  %v2508_v45 = vld [vmem:[#allocation7 + $0x3c0] sm:$0xff] }
 0xa6b   :  { %3421 = vmatprep.subr.bf16.mxu0 %v3420_v48  ;;  %v2476_v48 = vld [vmem:[#allocation7 + $0x2c0] sm:$0xff] }
 0xa6e   :  { %3423 = vmatpush1.bf16.msra.mxu0 %v3422_v60  ;;  %v2484_v60 = vld [vmem:[#allocation7 + $0x300] sm:$0xff] }
 0xa6f   :  { %3425 = vmatprep.subr.bf16.mxu0 %v3424_v2  ;;  %v3462_v2 = vpack.c.bf16 %v2486_v61, %v2484_v60  ;;  %v2623_v60 = vld [vmem:[%s4524_s21 + $0x98] sm:$0xff] }
 0xa72   :  { %3427 = vmatpush1.bf16.msra.mxu0 %v3426_v6  ;;  %v2488_v6 = vld [vmem:[#allocation7 + $0x320] sm:$0xff] }
 0xa73   :  { %v3466_v12 = vpack.c.bf16 %v2490_v7, %v2488_v6  ;;  %v2625_v6 = vld [vmem:[%s4524_s21 + $0xa8] sm:$0xff] }
 0xaa2   :  { %v2142_v52 = vpop.f32.mrb[8].mxu0 }
 0xaa3   :  { %v2143_v53 = vadd.f32 %v2142_v52, %v2069_v50  ;;  %v2144_v54 = vpop.f32.mrb[9].mxu0  ;;  %v2481_v50 = vld [vmem:[#allocation7 + $0x2e8] sm:$0xff]  ;;  %v3454_v52 = vpack.c.bf16 %v2478_v49, %v2476_v48  ;;  %v2515_v48 = vld [vmem:[#allocation7 + $0x3f8] sm:$0xff] }
 0xaa4   :  { %v2145_v4 = vadd.f32 %v2144_v54, %v2073_v51  ;;  %v2483_v51 = vld [vmem:[#allocation7 + $0x2f8] sm:$0xff]  ;;  %v2480_v54 = vld [vmem:[#allocation7 + $0x2e0] sm:$0xff] }
 0xaa6   :  { %3594 = vtanh.f32 %v2145_v4  ;;  %v2482_v4 = vld [vmem:[#allocation7 + $0x2f0] sm:$0xff] }
 0xaa7   :  { %3596 = vtanh.f32 %v2143_v53  ;;  %v3456_v53 = vpack.c.bf16 %v2483_v51, %v2481_v50  ;;  %v3458_v58 = vpack.c.bf16 %v2482_v4, %v2480_v54  ;;  %v2512_v51 = vld [vmem:[#allocation7 + $0x3e0] sm:$0xff]  ;;  %v2620_v54 = vld [vmem:[%s4524_s21 + $0x80] sm:$0xff]  ;;  %v2621_v4 = vld [vmem:[%s4524_s21 + $0x88] sm:$0xff] }
 0xab0   :  { %v3595_v55 = vpop.eup %3594 }
 0xab1   :  { %v3597_v56 = vpop.eup %3596  ;;  %2277 = vmatprep.mubr.f32.mxu1 %v3595_v55  ;;  %v2485_v55 = vld [vmem:[#allocation7 + $0x308] sm:$0xff] }
 0xab2   :  { %2278 = vmatmul.mubr.f32.vlgmr.msra.gmra.mrb[14].mxu1 %v3597_v56  ;;  %v2487_v56 = vld [vmem:[#allocation7 + $0x318] sm:$0xff] }
 0xab3   :  { %3431 = vmatpush1.bf16.msra.mxu1 %v3430_v11  ;;  %v3460_v59 = vpack.c.bf16 %v2487_v56, %v2485_v55  ;;  %v2497_v11 = vld [vmem:[#allocation7 + $0x368] sm:$0xff]  ;;  %v2604_v55 = vld [vmem:[%s4524_s21] sm:$0xff]  ;;  %v3492_v56 = vpack.c.bf16 %v2621_v4, %v2620_v54 }
 0xab4   :  { %3433 = vmatprep.subr.bf16.mxu1 %v3432_v16  ;;  %v2499_v16 = vld [vmem:[#allocation7 + $0x378] sm:$0xff] }
 0xab5   :  { %v3472_v18 = vpack.c.bf16 %v2499_v16, %v2497_v11  ;;  %3493 = vmatprep.subr.bf16.mxu0 %v3492_v56  ;;  %v2610_v16 = vld [vmem:[%s4524_s21 + $0x30] sm:$0xff] }
 0xab7   :  { %3435 = vmatpush1.bf16.msra.mxu1 %v3434_v21  ;;  %v3474_v21 = vpack.c.bf16 %v2498_v20, %v2496_v19  ;;  %v2629_v19 = vld [vmem:[%s4524_s21 + $0xc8] sm:$0xff] }
 0xab8   :  { %3437 = vmatprep.subr.bf16.mxu1 %v3436_v22  ;;  %v2286_v22 = vld [vmem:[%s4523_s20] sm:$0x3] }
 0xab9   :  { %v2295_v24 = vrot.slane %v2286_v22, %v3951_v63  ;;  %v2291_v26 = vrot.slane %v2286_v22, %v3948_v62  ;;  %v2612_v22 = vld [vmem:[%s4524_s21 + $0x40] sm:$0xff] }
 0xabb   :  { %3439 = vmatpush1.bf16.msra.mxu1 %v3438_v27 }
 0xabc   :  { %3441 = vmatprep.subr.bf16.mxu1 %v3440_v28 }
 0xabf   :  { %3443 = vmatpush1.bf16.msra.mxu1 %v3442_v57  ;;  %v3476_v57 = vpack.c.bf16 %v2503_v33, %v2501_v32  ;;  %v2615_v32 = vld [vmem:[%s4524_s21 + $0x58] sm:$0xff]  ;;  %v2632_v33 = vld [vmem:[%s4524_s21 + $0xe0] sm:$0xff] }
 0xac0   :  { %3445 = vmatprep.subr.bf16.mxu1 %v3444_v34  ;;  %v2500_v34 = vld [vmem:[#allocation7 + $0x380] sm:$0xff] }
 0xac1   :  { %v3478_v36 = vpack.c.bf16 %v2502_v35, %v2500_v34 }
 0xac3   :  { %3447 = vmatpush1.bf16.msra.mxu1 %v3446_v39 }
 0xac4   :  { %3449 = vmatprep.subr.bf16.mxu1 %v3448_v40  ;;  %v2509_v40 = vld [vmem:[#allocation7 + $0x3c8] sm:$0xff] }
 0xac5   :  { %v3484_v44 = vpack.c.bf16 %v2511_v41, %v2509_v40 }
 0xac7   :  { %3451 = vmatpush1.bf16.msra.mxu1 %v3450_v47  ;;  %v2510_v47 = vld [vmem:[#allocation7 + $0x3d0] sm:$0xff] }
 0xac8   :  { %3453 = vmatprep.subr.bf16.mxu1 %v3452_v46  ;;  %v2513_v46 = vld [vmem:[#allocation7 + $0x3e8] sm:$0xff]  ;;  %v3486_v49 = vpack.c.bf16 %v2510_v47, %v2508_v45  ;;  %v2617_v45 = vld [vmem:[%s4524_s21 + $0x68] sm:$0xff] }
 0xac9   :  { %v3488_v50 = vpack.c.bf16 %v2515_v48, %v2513_v46  ;;  %v2634_v46 = vld [vmem:[%s4524_s21 + $0xf0] sm:$0xff]  ;;  %v2635_v48 = vld [vmem:[%s4524_s21 + $0xf8] sm:$0xff] }
 0xacb   :  { %3455 = vmatpush1.bf16.msra.mxu1 %v3454_v52  ;;  %v2514_v52 = vld [vmem:[#allocation7 + $0x3f0] sm:$0xff] }
 0xacc   :  { %3457 = vmatprep.subr.bf16.mxu1 %v3456_v53  ;;  %v3490_v53 = vpack.c.bf16 %v2514_v52, %v2512_v51  ;;  %v2619_v51 = vld [vmem:[%s4524_s21 + $0x78] sm:$0xff] }
 0xacf   :  { %3459 = vmatpush1.bf16.msra.mxu1 %v3458_v58  ;;  %v2605_v58 = vld [vmem:[%s4524_s21 + $0x8] sm:$0xff] }
 0xad0   :  { %3461 = vmatprep.subr.bf16.mxu1 %v3460_v59  ;;  %v2622_v59 = vld [vmem:[%s4524_s21 + $0x90] sm:$0xff]  ;;  %v3494_v61 = vpack.c.bf16 %v2605_v58, %v2604_v55 }
 0xad1   :  { %v3496_v0 = vpack.c.bf16 %v2623_v60, %v2622_v59 }
 0xad3   :  { %3463 = vmatpush1.bf16.msra.mxu1 %v3462_v2  ;;  %v2607_v2 = vld [vmem:[%s4524_s21 + $0x18] sm:$0xff] }
 0xad4   :  { %3465 = vmatprep.subr.bf16.mxu1 %v3464_v3  ;;  %v2624_v3 = vld [vmem:[%s4524_s21 + $0xa0] sm:$0xff]  ;;  %v3498_v7 = vpack.c.bf16 %v2607_v2, %v2606_v1 }
 0xad5   :  { %v3500_v9 = vpack.c.bf16 %v2625_v6, %v2624_v3  ;;  %v2978_v1 = vld [vmem:[%s4525_s22] ss:$0 sm:$0xff] }
 0xad7   :  { %3467 = vmatpush1.bf16.msra.mxu1 %v3466_v12  ;;  %v2609_v12 = vld [vmem:[%s4524_s21 + $0x28] sm:$0xff] }
 0xad8   :  { %3469 = vmatprep.subr.bf16.mxu1 %v3468_v13  ;;  %v2626_v13 = vld [vmem:[%s4524_s21 + $0xb0] sm:$0xff]  ;;  %v3502_v15 = vpack.c.bf16 %v2609_v12, %v2608_v10 }
 0xad9   :  { %v3504_v11 = vpack.c.bf16 %v2627_v14, %v2626_v13 }
 0xadb   :  { %3471 = vmatpush1.bf16.msra.mxu1 %v3470_v17  ;;  %v2611_v17 = vld [vmem:[%s4524_s21 + $0x38] sm:$0xff] }
 0xadc   :  { %3473 = vmatprep.subr.bf16.mxu1 %v3472_v18  ;;  %v2628_v18 = vld [vmem:[%s4524_s21 + $0xc0] sm:$0xff]  ;;  %v3506_v20 = vpack.c.bf16 %v2611_v17, %v2610_v16 }
 0xadf   :  { %3475 = vmatpush1.bf16.msra.mxu1 %v3474_v21  ;;  %v3508_v21 = vpack.c.bf16 %v2629_v19, %v2628_v18 }
 0xae0   :  { %3477 = vmatprep.subr.bf16.mxu1 %v3476_v57  ;;  %v2633_v57 = vld [vmem:[%s4524_s21 + $0xe8] sm:$0xff] }
 0xae1   :  { %v3516_v35 = vpack.c.bf16 %v2633_v57, %v2632_v33 }
 0xae3   :  { %3479 = vmatpush1.bf16.msra.mxu1 %v3478_v36  ;;  %v2976_v36 = vld [vmem:[%s4521_s18 + $0x2] sm:$0x3] }
 0xb85   :  { %v2279_v23 = vpop.f32.mrb[14].mxu1 }
 0xb86   :  { %v2284_v25 = vadd.f32 %v4330_v8, %v2279_v23  ;;  %v2281_v27 = vpop.f32.mrb[15].mxu1  ;;  %v2505_v8 = vld [vmem:[#allocation7 + $0x3a8] sm:$0xff]  ;;  %v2613_v23 = vld [vmem:[%s4524_s21 + $0x48] sm:$0xff] }
 0xb87   :  { %v2285_v28 = vadd.f32 %v4324_v29, %v2281_v27  ;;  %v3480_v39 = vpack.c.bf16 %v2507_v37, %v2505_v8  ;;  %v2506_v29 = vld [vmem:[#allocation7 + $0x3b0] sm:$0xff]  ;;  %v2371_v8 = vrot.slane %v2976_v36, %v3948_v62  ;;  %v2375_v37 = vrot.slane %v2976_v36, %v3951_v63 }
 0xb88   :  { %v4354_v31 = vadd.f32 %v2291_v26, %v2284_v25  ;;  %v3482_v42 = vpack.c.bf16 %v2506_v29, %v2504_v38  ;;  %v2631_v25 = vld [vmem:[%s4524_s21 + $0xd8] sm:$0xff]  ;;  %v3510_v26 = vpack.c.bf16 %v2613_v23, %v2612_v22 }
 0xb89   :  { %v4352_v30 = vadd.f32 %v2295_v24, %v2285_v28  ;;  %3481 = vmatprep.subr.bf16.mxu1 %v3480_v39  ;;  %v2630_v24 = vld [vmem:[%s4524_s21 + $0xd0] sm:$0xff] }
 0xb8a   :  { %3483 = vmatpush1.bf16.msra.mxu1 %v3482_v42  ;;  %v3512_v27 = vpack.c.bf16 %v2631_v25, %v2630_v24  ;;  %v2614_v28 = vld [vmem:[%s4524_s21 + $0x50] sm:$0xff] }
 0xb8b   :  { %2442 = vmatprep.mubr.f32.mxu0 %v4352_v30  ;;  %3485 = vmatprep.subr.bf16.mxu1 %v3484_v44  ;;  %v3514_v34 = vpack.c.bf16 %v2615_v32, %v2614_v28  ;;  %v2616_v44 = vld [vmem:[%s4524_s21 + $0x60] sm:$0xff] }
 0xb8c   :  { %2443 = vmatmul.mubr.f32.vlgmr.msra.gmra.mrb[10].mxu0 %v4354_v31  ;;  %v3518_v47 = vpack.c.bf16 %v2617_v45, %v2616_v44 }
 0xb8d   :  { %3495 = vmatpush3.bf16.msra.mxu0 %v3494_v61 }
 0xb8e   :  { %3487 = vmatpush1.bf16.msra.mxu1 %v3486_v49  ;;  %3497 = vmatprep.subr.bf16.mxu0 %v3496_v0  ;;  %v2618_v49 = vld [vmem:[%s4524_s21 + $0x70] sm:$0xff] }
 0xb8f   :  { %3489 = vmatprep.subr.bf16.mxu1 %v3488_v50  ;;  %v3520_v50 = vpack.c.bf16 %v2635_v48, %v2634_v46  ;;  %v3522_v52 = vpack.c.bf16 %v2619_v51, %v2618_v49 }
 0xb91   :  { %3499 = vmatpush3.bf16.msra.mxu0 %v3498_v7 }
 0xb92   :  { %3491 = vmatpush1.bf16.msra.mxu1 %v3490_v53  ;;  %3501 = vmatprep.subr.bf16.mxu0 %v3500_v9  ;;  %v2977_v53 = vld [vmem:[%s4523_s20 + $0x2] sm:$0x3]  ;;  %s3725_s20 = smov [#allocation9]  }
 0xb93   :  { %3137 = vmatprep.subr.mxu1 %v3703_v5  ;;  %v2599_v4 = vrot.slane %v2977_v53, %v3951_v63  ;;  %v2595_v56 = vrot.slane %v2977_v53, %v3948_v62  ;;  %v2720_v63 = vpop.permute.xlu1 %2719  ;;  %s2887_s22 = sshll.u32 %s3725_s20, 4  ;;  %s2888_s22 = int_to_ptr.vmem [resolvable:$true] %s2887_s22 }
 0xb94   :  { %p3651_p3 = scmp.lt.s32.totalorder %s2888_s22, %s2888_s22 }
 0xb95   :  { %3503 = vmatpush3.bf16.msra.mxu0 %v3502_v15 }
 0xb96   :  { %3505 = vmatprep.subr.bf16.mxu0 %v3504_v11 }
 0xb99   :  { %3507 = vmatpush3.bf16.msra.mxu0 %v3506_v20 }
 0xb9a   :  { %3509 = vmatprep.subr.bf16.mxu0 %v3508_v21 }
 0xb9d   :  { %3511 = vmatpush3.bf16.msra.mxu0 %v3510_v26 }
 0xb9e   :  { %3513 = vmatprep.subr.bf16.mxu0 %v3512_v27 }
 0xba1   :  { %3515 = vmatpush3.bf16.msra.mxu0 %v3514_v34 }
 0xba2   :  { %3517 = vmatprep.subr.bf16.mxu0 %v3516_v35 }
 0xba5   :  { %3519 = vmatpush3.bf16.msra.mxu0 %v3518_v47 }
 0xba6   :  { %3521 = vmatprep.subr.bf16.mxu0 %v3520_v50 }
 0xba9   :  { %3523 = vmatpush3.bf16.msra.mxu0 %v3522_v52 }
 0xc5f   :  { %v2444_v38 = vpop.f32.mrb[10].mxu0 }
 0xc60   :  { %v2445_v39 = vadd.f32 %v2444_v38, %v2371_v8  ;;  %v2446_v29 = vpop.f32.mrb[11].mxu0 }
 0xc61   :  { %v2447_v40 = vadd.f32 %v2446_v29, %v2375_v37 }
 0xc63   :  { %3598 = vtanh.f32 %v2447_v40 }
 0xc64   :  { %3600 = vtanh.f32 %v2445_v39 }
 0xc6d   :  { %v3599_v41 = vpop.eup %3598 }
 0xc6e   :  { %v3601_v42 = vpop.eup %3600  ;;  %2580 = vmatprep.mubr.f32.mxu1 %v3599_v41 }
 0xc6f   :  { %2581 = vmatmul.mubr.f32.vlgmr.msra.gmra.mrb[16].mxu1 %v3601_v42 }
 0xc70   :  { %3139 = vmatprep.mubr.msk.f32.mxu1 %vm3723_vm9, %v3703_v5 }
 0xd42   :  { %v2582_v54 = vpop.f32.mrb[16].mxu1 }
 0xd43   :  { %v2587_v55 = vadd.f32 %v2582_v54, %v4354_v31  ;;  %v2584_v58 = vpop.f32.mrb[17].mxu1 }
 0xd44   :  { %v2588_v59 = vadd.f32 %v2584_v58, %v4352_v30  ;;  %v2801_v30 = vpop.permute.xlu1 %2800 }
 0xd45   :  { %v2602_v61 = vadd.f32 %v2595_v56, %v2587_v55 }
 0xd46   :  { %v2603_v60 = vadd.f32 %v2599_v4, %v2588_v59 }
 0xd48   :  { %2707 = vmatprep.mubr.f32.mxu0 %v2603_v60 }
 0xd49   :  { %2708 = vmatmul.mubr.f32.vlgmr.msra.gmra.mrb[12].mxu0 %v2602_v61 }
 0xe1c   :  { %v3075_v0 = vpop.f32.mrb[12].mxu0 }
 0xe1d   :  { %v3076_v2 = vpop.f32.mrb[13].mxu0 }
 0xe1e   :  { %v3077_v3 = vadd.f32 %v3076_v2, %v3075_v0 }
 0xe20   :  { %v2710_v6 = vadd.f32 %v3077_v3, %v2978_v1 }
 0xe22   :  { %v2722_v31 = vmul.f32 %v2720_v63, %v2710_v6 }
 0xe24   :  { %2802 = vrot.lane.b32.xlu0 %v2722_v31, %s3724_s16  ;;  %3138 = vmatpush3.xpose.msk.msra.mxu1 %vm2723_vm3, %v2722_v31  ;;  %s3646_s16 = scalar_lea.vmem %s2888_s22, 32 }
 0xe25   :  { %3142 = vmatprep.subr.mxu1 %v3703_v5  ;;  %p3647_p2 = scmp.ne.s32.totalorder %s2888_s22, %s3646_s16  ;;  %p3652_p4 = scmp.lt.s32.totalorder %s3646_s16, %s3646_s16 }
 0xe27   :  { %3140 = vmatmul.mubr.msk.f32.vlgmr.msra.gmra.mrb[18].mxu1 %vm2723_vm3, %v4336_v43  ;;  %p3653_p5 = por %p3652_p4, %p3651_p3 }
 0xe28   :  { %3144 = vmatprep.mubr.msk.f32.mxu1 %vm3723_vm9, %v3703_v5 }
 0xe29   :  { %p3654_p6 = pnand %p3653_p5, %p3647_p2 }
 0xe96   :  { %v2803_v62 = vpop.permute.xlu0 %2802 }
 0xe97   :  { %3143 = vmatpush3.xpose.msk.msra.mxu1 %vm2723_vm3, %v2803_v62 }
 0xe9a   :  { %3145 = vmatmul.mubr.msk.f32.vlgmr.msra.gmra.mrb[20].mxu1 %vm2723_vm3, %v2801_v30 }
 0xefa   :  { %v2796_v7 = vpop.f32.mrb[18].mxu1 }
 0xefb   :  { %v3141_v9 = vpop.f32.mrb[19].mxu1  ;;  %2879 = vst.msk [vmem:[#allocation9] sm:$0x3] %vm2878_vm0, %v2796_v7 }
 0xefc   :  { %3657 = shalt.err (!%p3654_p6)
}
 0xefd   :  { %s3658_s5 = scalar_lea.hbm %s4526_s23, 32 }
 0xefe   :  { %p3659_p7 = scmp.ne.s32.totalorder %s4526_s23, %s3658_s5  ;;  %p3662_p8 = scmp.lt.u32.totalorder %s3658_s5, %s4526_s23 }
 0xf00   :  { %p3664_p9 = pnand %p3662_p8, %p3659_p7 }
 0xf02   :  { %3667 = shalt.err (!%p3664_p9)
}
 0xf03   :  { %2890 = dma.vmem_to_hbm [thread:$0]  %s2888_s22, 32, %s4526_s23, [#allocation6]  }
 0xf04   :  { %s3726_s0 = smov [#allocation10]  }
 0xf05   :  { %s2897_s30 = sshll.u32 %s3726_s0, 4  ;;  %s2898_s30 = int_to_ptr.vmem [resolvable:$true] %s2897_s30 }
 0xf06   :  { %s3668_s17 = scalar_lea.vmem %s2898_s30, 32  ;;  %p3673_p11 = scmp.lt.s32.totalorder %s2898_s30, %s2898_s30 }
 0xf07   :  { %p3669_p10 = scmp.ne.s32.totalorder %s2898_s30, %s3668_s17  ;;  %p3674_p12 = scmp.lt.s32.totalorder %s3668_s17, %s3668_s17 }
 0xf09   :  { %p3675_p13 = por %p3674_p12, %p3673_p11 }
 0xf0b   :  { %p3676_p0 = pnand %p3675_p13, %p3669_p10 }
 0xf6d   :  { %v2874_v5 = vpop.f32.mrb[20].mxu1 }
 0xf6e   :  { %v3146_v43 = vpop.f32.mrb[21].mxu1  ;;  %2880 = vst.msk [vmem:[#allocation10] sm:$0x3] %vm2878_vm0, %v2874_v5 }
 0xf6f   :  { %3679 = shalt.err (!%p3676_p0)
}
 0xf70   :  { %s3680_s26 = scalar_lea.hbm %s4527_s24, 32 }
 0xf71   :  { %p3681_p1 = scmp.ne.s32.totalorder %s4527_s24, %s3680_s26  ;;  %p3684_p2 = scmp.lt.u32.totalorder %s3680_s26, %s4527_s24 }
 0xf73   :  { %p3686_p3 = pnand %p3684_p2, %p3681_p1 }
 0xf75   :  { %3689 = shalt.err (!%p3686_p3)
}
 0xf76   :  { %2900 = dma.vmem_to_hbm [thread:$0]  %s2898_s30, 32, %s4527_s24, [#allocation11]  }
 0xf77   :  { %3694 = dma.done.wait [#allocation6], 32  }
 0xf78   :  { %3695 = vsyncadd [#allocation6], 4294967264 }
 0xf79   :  { %3696 = dma.done.wait [#allocation11], 32  }
 0xf7a   :  { %3697 = vsyncadd [#allocation11], 4294967264 }
 0xf7b   :  { %2907 = vsyncpa [#allocation5], 1 }
 0xf7c   :  { %2908 = vsyncpa [#allocation8], 1 }
 0xf7d   :  { %2909 = vsyncpa [#allocation6], 1 }
 0xf7e   :  { %2910 = vsyncpa [#allocation11], 1 }

</bundles_post_ra>
